<compile_context>
chip_gen: v5e
topology: v5e:2x2
jax: 0.10.0
libtpu: 0.0.40
codegen_flags: <defaults>
</compile_context>

<pallas_src>
import functools

import jax
import jax.numpy as jnp
from jax.experimental import pallas as pl
from jax.experimental.pallas import tpu as pltpu


def _round_up(x, m):
    return ((x + m - 1) // m) * m


def _layer_norm_f32(x, w, b, eps=1e-5):
    mu = jnp.mean(x, axis=-1, keepdims=True)
    var = jnp.mean((x - mu) ** 2, axis=-1, keepdims=True)
    return (x - mu) * jax.lax.rsqrt(var + eps) * w + b


# -----------------------------------------------------------------------------
# Fused kernel: grid = (batch, layer); layer axis is "arbitrary" (resident activation).
# -----------------------------------------------------------------------------
def fused_transformer_kernel(
    # inputs
    x_ref, pos_ref,
    wqkv_ref, bqkv_ref, wo_ref, bo_ref,
    ln1w_ref, ln1b_ref, w1_ref, b1_ref, w2_ref, b2_ref, ln2w_ref, ln2b_ref,
    pw1_ref, pb1_ref, pw2_ref, pb2_ref,
    sw1a_ref, sw1b_ref, sb1_ref, sw2_ref, sb2_ref,
    # outputs
    pred_ref, score_ref,
    # scratch
    x_sc,
    *, num_heads):
    l = pl.program_id(1)
    nl = pl.num_programs(1)
    _, S, D = x_ref.shape                 # per-grid-step batch block is 1
    H = num_heads
    dh = D // H

    # --- one-time per-batch init: positional add (hoisted out of the layer loop) ---------
    @pl.when(l == 0)
    def _init():
        x_sc[...] = (x_ref[...] + pos_ref[...][None]).astype(jnp.bfloat16)

    x_bf = x_sc[...]                      # (1, S, D) bf16 resident activation
    x_f32 = x_bf.astype(jnp.float32)

    # --- self attention -------------------------------------------------------------------
    # one K=D, N=3D matmul; the 1/sqrt(dh) q-scale is folded into the weights at init.
    qkv = jnp.einsum('bsd,de->bse', x_bf, wqkv_ref[0],
                     preferred_element_type=jnp.float32) + bqkv_ref[0]
    qkv = qkv.astype(jnp.bfloat16)        # single cast (no per-head casts)
    q = qkv[:, :, :D]
    k = qkv[:, :, D:2 * D]
    v = qkv[:, :, 2 * D:]

    # causal mask from iota (no (S,S) scratch); broadcast hoisted out of the head loop
    row = jax.lax.broadcasted_iota(jnp.int32, (S, S), 0)
    col = jax.lax.broadcasted_iota(jnp.int32, (S, S), 1)
    negb = jnp.where(col > row, jnp.float32(-1e30), jnp.float32(0.0))[None]   # (1, S, S)

    # TODO(synk): per-head lane slices remain; replace with a head-batched (B*H, S, dh)
    #             layout + flash tiling at production S.
    ctx_parts = []
    for h in range(H):
        qh = q[:, :, h * dh:(h + 1) * dh]
        kh = k[:, :, h * dh:(h + 1) * dh]
        vh = v[:, :, h * dh:(h + 1) * dh]
        s = jnp.einsum('bqd,bkd->bqk', qh, kh,
                       preferred_element_type=jnp.float32) + negb
        m = jnp.max(s, axis=-1, keepdims=True)
        p = jnp.exp(s - m)
        p = p * pl.reciprocal(jnp.sum(p, axis=-1, keepdims=True), approx=True)
        ctx_parts.append(jnp.einsum('bqk,bkd->bqd', p.astype(jnp.bfloat16), vh,
                                    preferred_element_type=jnp.float32))
    # reassemble heads -> one output projection with K=D (full MXU fill)
    ctx = jnp.concatenate(ctx_parts, axis=-1).astype(jnp.bfloat16)            # (1, S, D)
    attn = jnp.einsum('bsd,de->bse', ctx, wo_ref[0],
                      preferred_element_type=jnp.float32) + bo_ref[0]

    x1 = _layer_norm_f32(x_f32 + attn, ln1w_ref[0], ln1b_ref[0])

    # --- feed forward (Linear -> ReLU -> Linear) --------------------------------------------
    h1 = jnp.einsum('bsd,de->bse', x1.astype(jnp.bfloat16), w1_ref[0],
                    preferred_element_type=jnp.float32) + b1_ref[0]
    h1 = jnp.maximum(h1, 0.0)
    ff = jnp.einsum('bse,ed->bsd', h1.astype(jnp.bfloat16), w2_ref[0],
                    preferred_element_type=jnp.float32) + b2_ref[0]

    x2 = _layer_norm_f32(x1 + ff, ln2w_ref[0], ln2b_ref[0])
    x_sc[...] = x2.astype(jnp.bfloat16)   # activation stays resident (bf16) for next layer

    # --- heads: only after the last encoder layer -------------------------------------------
    @pl.when(l == nl - 1)
    def _heads():
        xt = x_sc[...]                                    # (1, S, D) bf16

        # event predictor (hidden dim zero-padded to a lane-dense multiple of 128)
        hp = jnp.einsum('bsd,dg->bsg', xt, pw1_ref[...],
                        preferred_element_type=jnp.float32) + pb1_ref[...]
        hp = jnp.maximum(hp, 0.0)
        pred = jnp.einsum('bsg,gd->bsd', hp.astype(jnp.bfloat16), pw2_ref[...],
                          preferred_element_type=jnp.float32) + pb2_ref[...]
        pred_ref[...] = pred.astype(pred_ref.dtype)

        # causality scorer on consecutive pairs — the (2D) pair-concat never materializes:
        # the first linear is split into two (D, D) halves applied to shifted views.
        sm1 = S - 1
        x_prev = xt[:, :sm1, :]
        x_next = xt[:, 1:, :]
        hs = (jnp.einsum('bsd,de->bse', x_prev, sw1a_ref[...],
                         preferred_element_type=jnp.float32)
              + jnp.einsum('bsd,de->bse', x_next, sw1b_ref[...],
                           preferred_element_type=jnp.float32)
              + sb1_ref[...])
        hs = jnp.maximum(hs, 0.0)                         # (1, S-1, D) f32
        # final (D, 1) linear as multiply + lane reduction; lane-dense (1, 1, S-1) store
        score = jnp.sum(hs * sw2_ref[...], axis=-1) + sb2_ref[...]            # (1, S-1)
        score_ref[...] = jax.nn.sigmoid(score)[:, None, :].astype(score_ref.dtype)


# -----------------------------------------------------------------------------
# Parameters (already transposed to [in, out]; matmul weights stored in bf16)
# -----------------------------------------------------------------------------
def init_params(key, input_dim, num_heads, num_layers, max_sequence_length):
    D, L = input_dim, num_layers
    dh = D // num_heads
    ks = jax.random.split(key, 10)
    sc = 0.02

    def nrm(k, shape):
        return sc * jax.random.normal(k, shape, dtype=jnp.float32)

    ph = max(128, _round_up(D // 2, 128))   # lane-dense predictor hidden dim

    # fold the attention 1/sqrt(dh) scale into the q columns of the QKV projection (free)
    qcol_scale = jnp.concatenate(
        [jnp.full((D,), 1.0 / (dh ** 0.5), jnp.float32),
         jnp.ones((2 * D,), jnp.float32)])

    params = dict(
        pos=jax.random.normal(ks[0], (max_sequence_length, D), jnp.float32),
        # stacked encoder-layer weights (leading layer axis)
        wqkv=nrm(ks[1], (L, D, 3 * D)) * qcol_scale,
        bqkv=jnp.zeros((L, 1, 3 * D), jnp.float32) * qcol_scale,
        wo=nrm(ks[2], (L, D, D)),       bo=jnp.zeros((L, 1, D), jnp.float32),
        ln1w=jnp.ones((L, 1, D), jnp.float32), ln1b=jnp.zeros((L, 1, D), jnp.float32),
        w1=nrm(ks[3], (L, D, 4 * D)),   b1=jnp.zeros((L, 1, 4 * D), jnp.float32),
        w2=nrm(ks[4], (L, 4 * D, D)),   b2=jnp.zeros((L, 1, D), jnp.float32),
        ln2w=jnp.ones((L, 1, D), jnp.float32), ln2b=jnp.zeros((L, 1, D), jnp.float32),
        # event predictor: Linear(D, D//2) -> ReLU -> Linear(D//2, D); hidden zero-padded
        pw1=jnp.zeros((D, ph), jnp.float32).at[:, :D // 2].set(nrm(ks[5], (D, D // 2))),
        pb1=jnp.zeros((1, ph), jnp.float32),
        pw2=jnp.zeros((ph, D), jnp.float32).at[:D // 2, :].set(nrm(ks[6], (D // 2, D))),
        pb2=jnp.zeros((1, D), jnp.float32),
        # causality scorer: Linear(2D, D) split into two (D, D) halves -> ReLU -> (D,1) -> Sigmoid
        sw1a=nrm(ks[7], (D, D)), sw1b=nrm(ks[8], (D, D)),
        sb1=jnp.zeros((1, D), jnp.float32),
        sw2=nrm(ks[9], (1, D)),                 # row vector (applied as mul + lane reduce)
        sb2=jnp.zeros((1, 1), jnp.float32),
    )
    for name in ('wqkv', 'wo', 'w1', 'w2', 'pw1', 'pw2', 'sw1a', 'sw1b'):
        params[name] = params[name].astype(jnp.bfloat16)
    return params


def _vmem_limit_bytes(S, D, ph):
    bf16, f32 = 2, 4
    blocks = (
        S * D * f32 + S * D * f32                               # x, pos
        + D * 3 * D * bf16 + 3 * D * f32                        # wqkv, bqkv
        + D * D * bf16 + D * f32                                # wo, bo
        + 2 * D * f32                                           # ln1
        + D * 4 * D * bf16 + 4 * D * f32                        # w1, b1
        + 4 * D * D * bf16 + D * f32                            # w2, b2
        + 2 * D * f32                                           # ln2
        + D * ph * bf16 + ph * f32 + ph * D * bf16 + D * f32    # event predictor
        + 2 * D * D * bf16 + D * f32 + D * f32 + f32            # causality scorer
        + S * D * f32 + (S - 1) * f32                           # outputs
    )
    interm = (
        S * 3 * D * (f32 + bf16)          # qkv
        + 3 * S * S * f32                 # per-head scores / probs / mask
        + S * D * (f32 + bf16)            # reassembled ctx
        + S * 4 * D * (f32 + bf16)        # FFN hidden
        + 4 * S * D * f32                 # residual / LN temporaries
        + S * ph * (f32 + bf16)           # predictor hidden
        + 2 * (S - 1) * D * f32           # scorer hidden
    )
    total = 2 * blocks + S * D * bf16 + interm        # 2x for double-buffered blocks + scratch
    return int(min(110 * 2 ** 20, max(2 * total, 32 * 2 ** 20)))


# -----------------------------------------------------------------------------
# Wrapper
# -----------------------------------------------------------------------------
def causal_transformer_forward(event_embeddings, params, num_heads):
    B, S, D = event_embeddings.shape
    L = params['wqkv'].shape[0]
    ph = params['pw1'].shape[1]
    assert S >= 2  # TODO(synk): S == 1 (empty causality_scores) path not handled by the fused kernel

    pos = params['pos'][:S]

    def stacked(shape2d):   # per-layer stacked params: block picks layer l's slice
        return pl.BlockSpec((1,) + shape2d, lambda b, l: (l, 0, 0))

    def whole(shape):       # layer/batch-independent params: constant block
        nd = len(shape)
        return pl.BlockSpec(shape, lambda b, l, nd=nd: (0,) * nd)

    in_specs = [
        pl.BlockSpec((1, S, D), lambda b, l: (b, 0, 0)),   # x (per-batch block)
        whole((S, D)),                                     # pos
        stacked((D, 3 * D)), stacked((1, 3 * D)),          # wqkv, bqkv
        stacked((D, D)),     stacked((1, D)),              # wo, bo
        stacked((1, D)),     stacked((1, D)),              # ln1w, ln1b
        stacked((D, 4 * D)), stacked((1, 4 * D)),          # w1, b1
        stacked((4 * D, D)), stacked((1, D)),              # w2, b2
        stacked((1, D)),     stacked((1, D)),              # ln2w, ln2b
        whole((D, ph)), whole((1, ph)),                    # pw1, pb1
        whole((ph, D)), whole((1, D)),                     # pw2, pb2
        whole((D, D)), whole((D, D)), whole((1, D)),       # sw1a, sw1b, sb1
        whole((1, D)), whole((1, 1)),                      # sw2, sb2
    ]
    out_specs = [
        pl.BlockSpec((1, S, D), lambda b, l: (b, 0, 0)),
        pl.BlockSpec((1, 1, S - 1), lambda b, l: (b, 0, 0)),   # lane-dense score slab
    ]
    out_shape = [
        jax.ShapeDtypeStruct((B, S, D), jnp.float32),
        jax.ShapeDtypeStruct((B, 1, S - 1), jnp.float32),
    ]
    scratch_shapes = [
        pltpu.VMEM((1, S, D), jnp.bfloat16),   # bf16 resident activation across the layer axis
    ]

    kernel = functools.partial(fused_transformer_kernel, num_heads=num_heads)
    pred, scores = pl.pallas_call(
        kernel,
        grid=(B, L),
        in_specs=in_specs,
        out_specs=out_specs,
        out_shape=out_shape,
        scratch_shapes=scratch_shapes,
        compiler_params=pltpu.CompilerParams(
            dimension_semantics=("parallel", "arbitrary"),   # batch parallel (v7x 2 TCs), layer sequential
            vmem_limit_bytes=_vmem_limit_bytes(S, D, ph)),
    )(event_embeddings, pos,
      params['wqkv'], params['bqkv'], params['wo'], params['bo'],
      params['ln1w'], params['ln1b'], params['w1'], params['b1'],
      params['w2'], params['b2'], params['ln2w'], params['ln2b'],
      params['pw1'], params['pb1'], params['pw2'], params['pb2'],
      params['sw1a'], params['sw1b'], params['sb1'], params['sw2'], params['sb2'])
    return pred, scores.reshape(B, S - 1, 1)


# -----------------------------------------------------------------------------
# Main
# -----------------------------------------------------------------------------
if __name__ == "__main__":
    B, S = 2, 8
    INPUT_DIM, NUM_HEADS, NUM_LAYERS, MAX_SEQ = 64, 4, 2, 16

    key = jax.random.PRNGKey(0)
    k_params, k_x = jax.random.split(key)

    params = init_params(k_params, INPUT_DIM, NUM_HEADS, NUM_LAYERS, MAX_SEQ)
    event_embeddings = jax.random.normal(k_x, (B, S, INPUT_DIM), dtype=jnp.float32)

    fwd = jax.jit(functools.partial(causal_transformer_forward, num_heads=NUM_HEADS))
    predicted_events, causality_scores = fwd(event_embeddings, params)
    jax.block_until_ready((predicted_events, causality_scores))

    assert predicted_events.shape == (B, S, INPUT_DIM)
    assert causality_scores.shape == (B, S - 1, 1)
    assert bool(jnp.all(jnp.isfinite(predicted_events)))
    assert bool(jnp.all((causality_scores >= 0.0) & (causality_scores <= 1.0)))

    print("KERNEL_OK")
</pallas_src>

<mosaic_0001>
module attributes {stable_mosaic.version = 11 : i64} {
  func.func @fused_transformer_kernel(%arg0: i32, %arg1: i32, %arg2: memref<1x8x64xf32, #tpu.memory_space<vmem>>, %arg3: memref<8x64xf32, #tpu.memory_space<vmem>>, %arg4: memref<1x64x192xbf16, #tpu.memory_space<vmem>>, %arg5: memref<1x1x192xf32, #tpu.memory_space<vmem>>, %arg6: memref<1x64x64xbf16, #tpu.memory_space<vmem>>, %arg7: memref<1x1x64xf32, #tpu.memory_space<vmem>>, %arg8: memref<1x1x64xf32, #tpu.memory_space<vmem>>, %arg9: memref<1x1x64xf32, #tpu.memory_space<vmem>>, %arg10: memref<1x64x256xbf16, #tpu.memory_space<vmem>>, %arg11: memref<1x1x256xf32, #tpu.memory_space<vmem>>, %arg12: memref<1x256x64xbf16, #tpu.memory_space<vmem>>, %arg13: memref<1x1x64xf32, #tpu.memory_space<vmem>>, %arg14: memref<1x1x64xf32, #tpu.memory_space<vmem>>, %arg15: memref<1x1x64xf32, #tpu.memory_space<vmem>>, %arg16: memref<64x128xbf16, #tpu.memory_space<vmem>>, %arg17: memref<1x128xf32, #tpu.memory_space<vmem>>, %arg18: memref<128x64xbf16, #tpu.memory_space<vmem>>, %arg19: memref<1x64xf32, #tpu.memory_space<vmem>>, %arg20: memref<64x64xbf16, #tpu.memory_space<vmem>>, %arg21: memref<64x64xbf16, #tpu.memory_space<vmem>>, %arg22: memref<1x64xf32, #tpu.memory_space<vmem>>, %arg23: memref<1x64xf32, #tpu.memory_space<vmem>>, %arg24: memref<1x1xf32, #tpu.memory_space<vmem>>, %arg25: memref<1x8x64xf32, #tpu.memory_space<vmem>>, %arg26: memref<1x1x7xf32, #tpu.memory_space<vmem>>, %arg27: memref<1x8x64xbf16, #tpu.memory_space<vmem>>) attributes {dimension_semantics = [#tpu.dimension_semantics<parallel>, #tpu.dimension_semantics<arbitrary>], iteration_bounds = array<i64: 2, 2>, scalar_prefetch = 0 : i64, scratch_operands = 1 : i64, tpu.core_type = #tpu.core_type<tc>, window_params = [{transform_indices = @transform_0, window_bounds = array<i64: 1, 8, 64>}, {pipeline_mode = #tpu.pipeline_mode<synchronous>, transform_indices = @transform_1, window_bounds = array<i64: 8, 64>}, {transform_indices = @transform_2, window_bounds = array<i64: 1, 64, 192>}, {transform_indices = @transform_3, window_bounds = array<i64: 1, 1, 192>}, {transform_indices = @transform_4, window_bounds = array<i64: 1, 64, 64>}, {transform_indices = @transform_5, window_bounds = array<i64: 1, 1, 64>}, {transform_indices = @transform_6, window_bounds = array<i64: 1, 1, 64>}, {transform_indices = @transform_7, window_bounds = array<i64: 1, 1, 64>}, {transform_indices = @transform_8, window_bounds = array<i64: 1, 64, 256>}, {transform_indices = @transform_9, window_bounds = array<i64: 1, 1, 256>}, {transform_indices = @transform_10, window_bounds = array<i64: 1, 256, 64>}, {transform_indices = @transform_11, window_bounds = array<i64: 1, 1, 64>}, {transform_indices = @transform_12, window_bounds = array<i64: 1, 1, 64>}, {transform_indices = @transform_13, window_bounds = array<i64: 1, 1, 64>}, {pipeline_mode = #tpu.pipeline_mode<synchronous>, transform_indices = @transform_14, window_bounds = array<i64: 64, 128>}, {pipeline_mode = #tpu.pipeline_mode<synchronous>, transform_indices = @transform_15, window_bounds = array<i64: 1, 128>}, {pipeline_mode = #tpu.pipeline_mode<synchronous>, transform_indices = @transform_16, window_bounds = array<i64: 128, 64>}, {pipeline_mode = #tpu.pipeline_mode<synchronous>, transform_indices = @transform_17, window_bounds = array<i64: 1, 64>}, {pipeline_mode = #tpu.pipeline_mode<synchronous>, transform_indices = @transform_18, window_bounds = array<i64: 64, 64>}, {pipeline_mode = #tpu.pipeline_mode<synchronous>, transform_indices = @transform_19, window_bounds = array<i64: 64, 64>}, {pipeline_mode = #tpu.pipeline_mode<synchronous>, transform_indices = @transform_20, window_bounds = array<i64: 1, 64>}, {pipeline_mode = #tpu.pipeline_mode<synchronous>, transform_indices = @transform_21, window_bounds = array<i64: 1, 64>}, {pipeline_mode = #tpu.pipeline_mode<synchronous>, transform_indices = @transform_22, window_bounds = array<i64: 1, 1>}, {transform_indices = @transform_23, window_bounds = array<i64: 1, 8, 64>}, {transform_indices = @transform_24, window_bounds = array<i64: 1, 1, 7>}]} {
    %c0_i32 = arith.constant 0 : i32
    %0 = arith.cmpi eq, %arg1, %c0_i32 : i32
    %1 = arith.extui %0 : i1 to i32
    %c0_i32_0 = arith.constant 0 : i32
    %2 = arith.cmpi ne, %1, %c0_i32_0 : i32
    scf.if %2 {
      %c0_75 = arith.constant 0 : index
      %c0_76 = arith.constant 0 : index
      %c0_77 = arith.constant 0 : index
      %185 = vector.load %arg2[%c0_75, %c0_76, %c0_77] : memref<1x8x64xf32, #tpu.memory_space<vmem>>, vector<1x8x64xf32>
      %c0_78 = arith.constant 0 : index
      %c0_79 = arith.constant 0 : index
      %186 = vector.load %arg3[%c0_78, %c0_79] : memref<8x64xf32, #tpu.memory_space<vmem>>, vector<8x64xf32>
      %187 = vector.shape_cast %186 : vector<8x64xf32> to vector<1x8x64xf32>
      %188 = arith.addf %185, %187 : vector<1x8x64xf32>
      %189 = arith.truncf %188 : vector<1x8x64xf32> to vector<1x8x64xbf16>
      %c0_80 = arith.constant 0 : index
      %c0_81 = arith.constant 0 : index
      %c0_82 = arith.constant 0 : index
      %190 = vector.load %arg27[%c0_80, %c0_81, %c0_82] : memref<1x8x64xbf16, #tpu.memory_space<vmem>>, vector<1x8x64xbf16>
      tpu.vector_store %arg27[%c0_80, %c0_81, %c0_82], %189 {strides = array<i32>} : memref<1x8x64xbf16, #tpu.memory_space<vmem>>, vector<1x8x64xbf16>,
    } else {
    }
    %c0 = arith.constant 0 : index
    %c0_1 = arith.constant 0 : index
    %c0_2 = arith.constant 0 : index
    %3 = vector.load %arg27[%c0, %c0_1, %c0_2] : memref<1x8x64xbf16, #tpu.memory_space<vmem>>, vector<1x8x64xbf16>
    %4 = arith.extf %3 : vector<1x8x64xbf16> to vector<1x8x64xf32>
    %c0_3 = arith.constant 0 : index
    %c0_4 = arith.constant 0 : index
    %c0_5 = arith.constant 0 : index
    %5 = vector.load %arg4[%c0_3, %c0_4, %c0_5] : memref<1x64x192xbf16, #tpu.memory_space<vmem>>, vector<1x64x192xbf16>
    %6 = vector.shape_cast %5 : vector<1x64x192xbf16> to vector<64x192xbf16>
    "tpu.trace_start"() <{level = 10 : i32, message = "bsd,de->bse"}> : () -> ()
    %cst = arith.constant dense<0.000000e+00> : vector<1x8x192xf32>
    %7 = tpu.matmul %3, %6, %cst {dimension_numbers = #tpu.dot_dimension_numbers<[2], [0], [0, 1], [1], [0, 0, 0, 1, 1, 1], [], []>} : vector<1x8x64xbf16>, vector<64x192xbf16>, vector<1x8x192xf32> -> vector<1x8x192xf32>
    "tpu.trace_stop"() : () -> ()
    %c0_6 = arith.constant 0 : index
    %c0_7 = arith.constant 0 : index
    %c0_8 = arith.constant 0 : index
    %8 = vector.load %arg5[%c0_6, %c0_7, %c0_8] : memref<1x1x192xf32, #tpu.memory_space<vmem>>, vector<1x1x192xf32>
    %9 = vector.shape_cast %8 : vector<1x1x192xf32> to vector<1x192xf32>
    %10 = vector.shape_cast %9 : vector<1x192xf32> to vector<1x1x192xf32>
    %11 = vector.broadcast %10 : vector<1x1x192xf32> to vector<1x8x192xf32>
    %12 = arith.addf %7, %11 : vector<1x8x192xf32>
    %13 = arith.truncf %12 : vector<1x8x192xf32> to vector<1x8x192xbf16>
    %14 = vector.extract_strided_slice %13 {offsets = [0, 0, 0], sizes = [1, 8, 64], strides = [1, 1, 1]} : vector<1x8x192xbf16> to vector<1x8x64xbf16>
    %15 = vector.extract_strided_slice %13 {offsets = [0, 0, 64], sizes = [1, 8, 64], strides = [1, 1, 1]} : vector<1x8x192xbf16> to vector<1x8x64xbf16>
    %16 = vector.extract_strided_slice %13 {offsets = [0, 0, 128], sizes = [1, 8, 64], strides = [1, 1, 1]} : vector<1x8x192xbf16> to vector<1x8x64xbf16>
    %17 = tpu.iota {dimensions = array<i32: 0>} : vector<8x8xi32>
    %18 = tpu.iota {dimensions = array<i32: 1>} : vector<8x8xi32>
    %19 = arith.cmpi sgt, %18, %17 : vector<8x8xi32>
    %cst_9 = arith.constant -1.000000e+30 : f32
    %cst_10 = arith.constant 0.000000e+00 : f32
    %20 = vector.broadcast %cst_9 : f32 to vector<8x8xf32>
    %21 = vector.broadcast %cst_10 : f32 to vector<8x8xf32>
    %22 = arith.select %19, %20, %21 : vector<8x8xi1>, vector<8x8xf32>
    %23 = vector.shape_cast %22 : vector<8x8xf32> to vector<1x8x8xf32>
    %24 = vector.extract_strided_slice %14 {offsets = [0, 0, 0], sizes = [1, 8, 16], strides = [1, 1, 1]} : vector<1x8x64xbf16> to vector<1x8x16xbf16>
    %25 = vector.extract_strided_slice %15 {offsets = [0, 0, 0], sizes = [1, 8, 16], strides = [1, 1, 1]} : vector<1x8x64xbf16> to vector<1x8x16xbf16>
    %26 = vector.extract_strided_slice %16 {offsets = [0, 0, 0], sizes = [1, 8, 16], strides = [1, 1, 1]} : vector<1x8x64xbf16> to vector<1x8x16xbf16>
    "tpu.trace_start"() <{level = 10 : i32, message = "bqd,bkd->bqk"}> : () -> ()
    %cst_11 = arith.constant dense<0.000000e+00> : vector<1x8x8xf32>
    %27 = tpu.matmul %24, %25, %cst_11 {dimension_numbers = #tpu.dot_dimension_numbers<[2], [2], [1], [1], [0, 0, 0, 1, 1, 1], [0], [0]>} : vector<1x8x16xbf16>, vector<1x8x16xbf16>, vector<1x8x8xf32> -> vector<1x8x8xf32>
    "tpu.trace_stop"() : () -> ()
    %28 = arith.addf %27, %23 : vector<1x8x8xf32>
    %cst_12 = arith.constant dense<0xFF800000> : vector<1x8xf32>
    %29 = vector.multi_reduction <maximumf>, %28, %cst_12 [2] : vector<1x8x8xf32> to vector<1x8xf32>
    %30 = vector.shape_cast %29 : vector<1x8xf32> to vector<1x8x1xf32>
    %31 = vector.broadcast %30 : vector<1x8x1xf32> to vector<1x8x8xf32>
    %32 = arith.subf %28, %31 : vector<1x8x8xf32>
    %33 = math.exp %32 : vector<1x8x8xf32>
    %cst_13 = arith.constant dense<0.000000e+00> : vector<1x8xf32>
    %34 = vector.multi_reduction <add>, %33, %cst_13 [2] : vector<1x8x8xf32> to vector<1x8xf32>
    %35 = vector.shape_cast %34 : vector<1x8xf32> to vector<1x8x1xf32>
    %36 = tpu.reciprocal %35 {approx = true} : vector<1x8x1xf32> -> vector<1x8x1xf32>
    %37 = vector.broadcast %36 : vector<1x8x1xf32> to vector<1x8x8xf32>
    %38 = arith.mulf %33, %37 : vector<1x8x8xf32>
    %39 = arith.truncf %38 : vector<1x8x8xf32> to vector<1x8x8xbf16>
    "tpu.trace_start"() <{level = 10 : i32, message = "bqk,bkd->bqd"}> : () -> ()
    %cst_14 = arith.constant dense<0.000000e+00> : vector<1x8x16xf32>
    %40 = tpu.matmul %39, %26, %cst_14 {dimension_numbers = #tpu.dot_dimension_numbers<[2], [1], [1], [2], [0, 0, 0, 1, 1, 2], [0], [0]>} : vector<1x8x8xbf16>, vector<1x8x16xbf16>, vector<1x8x16xf32> -> vector<1x8x16xf32>
    "tpu.trace_stop"() : () -> ()
    %41 = vector.extract_strided_slice %14 {offsets = [0, 0, 16], sizes = [1, 8, 16], strides = [1, 1, 1]} : vector<1x8x64xbf16> to vector<1x8x16xbf16>
    %42 = vector.extract_strided_slice %15 {offsets = [0, 0, 16], sizes = [1, 8, 16], strides = [1, 1, 1]} : vector<1x8x64xbf16> to vector<1x8x16xbf16>
    %43 = vector.extract_strided_slice %16 {offsets = [0, 0, 16], sizes = [1, 8, 16], strides = [1, 1, 1]} : vector<1x8x64xbf16> to vector<1x8x16xbf16>
    "tpu.trace_start"() <{level = 10 : i32, message = "bqd,bkd->bqk"}> : () -> ()
    %cst_15 = arith.constant dense<0.000000e+00> : vector<1x8x8xf32>
    %44 = tpu.matmul %41, %42, %cst_15 {dimension_numbers = #tpu.dot_dimension_numbers<[2], [2], [1], [1], [0, 0, 0, 1, 1, 1], [0], [0]>} : vector<1x8x16xbf16>, vector<1x8x16xbf16>, vector<1x8x8xf32> -> vector<1x8x8xf32>
    "tpu.trace_stop"() : () -> ()
    %45 = arith.addf %44, %23 : vector<1x8x8xf32>
    %cst_16 = arith.constant dense<0xFF800000> : vector<1x8xf32>
    %46 = vector.multi_reduction <maximumf>, %45, %cst_16 [2] : vector<1x8x8xf32> to vector<1x8xf32>
    %47 = vector.shape_cast %46 : vector<1x8xf32> to vector<1x8x1xf32>
    %48 = vector.broadcast %47 : vector<1x8x1xf32> to vector<1x8x8xf32>
    %49 = arith.subf %45, %48 : vector<1x8x8xf32>
    %50 = math.exp %49 : vector<1x8x8xf32>
    %cst_17 = arith.constant dense<0.000000e+00> : vector<1x8xf32>
    %51 = vector.multi_reduction <add>, %50, %cst_17 [2] : vector<1x8x8xf32> to vector<1x8xf32>
    %52 = vector.shape_cast %51 : vector<1x8xf32> to vector<1x8x1xf32>
    %53 = tpu.reciprocal %52 {approx = true} : vector<1x8x1xf32> -> vector<1x8x1xf32>
    %54 = vector.broadcast %53 : vector<1x8x1xf32> to vector<1x8x8xf32>
    %55 = arith.mulf %50, %54 : vector<1x8x8xf32>
    %56 = arith.truncf %55 : vector<1x8x8xf32> to vector<1x8x8xbf16>
    "tpu.trace_start"() <{level = 10 : i32, message = "bqk,bkd->bqd"}> : () -> ()
    %cst_18 = arith.constant dense<0.000000e+00> : vector<1x8x16xf32>
    %57 = tpu.matmul %56, %43, %cst_18 {dimension_numbers = #tpu.dot_dimension_numbers<[2], [1], [1], [2], [0, 0, 0, 1, 1, 2], [0], [0]>} : vector<1x8x8xbf16>, vector<1x8x16xbf16>, vector<1x8x16xf32> -> vector<1x8x16xf32>
    "tpu.trace_stop"() : () -> ()
    %58 = vector.extract_strided_slice %14 {offsets = [0, 0, 32], sizes = [1, 8, 16], strides = [1, 1, 1]} : vector<1x8x64xbf16> to vector<1x8x16xbf16>
    %59 = vector.extract_strided_slice %15 {offsets = [0, 0, 32], sizes = [1, 8, 16], strides = [1, 1, 1]} : vector<1x8x64xbf16> to vector<1x8x16xbf16>
    %60 = vector.extract_strided_slice %16 {offsets = [0, 0, 32], sizes = [1, 8, 16], strides = [1, 1, 1]} : vector<1x8x64xbf16> to vector<1x8x16xbf16>
    "tpu.trace_start"() <{level = 10 : i32, message = "bqd,bkd->bqk"}> : () -> ()
    %cst_19 = arith.constant dense<0.000000e+00> : vector<1x8x8xf32>
    %61 = tpu.matmul %58, %59, %cst_19 {dimension_numbers = #tpu.dot_dimension_numbers<[2], [2], [1], [1], [0, 0, 0, 1, 1, 1], [0], [0]>} : vector<1x8x16xbf16>, vector<1x8x16xbf16>, vector<1x8x8xf32> -> vector<1x8x8xf32>
    "tpu.trace_stop"() : () -> ()
    %62 = arith.addf %61, %23 : vector<1x8x8xf32>
    %cst_20 = arith.constant dense<0xFF800000> : vector<1x8xf32>
    %63 = vector.multi_reduction <maximumf>, %62, %cst_20 [2] : vector<1x8x8xf32> to vector<1x8xf32>
    %64 = vector.shape_cast %63 : vector<1x8xf32> to vector<1x8x1xf32>
    %65 = vector.broadcast %64 : vector<1x8x1xf32> to vector<1x8x8xf32>
    %66 = arith.subf %62, %65 : vector<1x8x8xf32>
    %67 = math.exp %66 : vector<1x8x8xf32>
    %cst_21 = arith.constant dense<0.000000e+00> : vector<1x8xf32>
    %68 = vector.multi_reduction <add>, %67, %cst_21 [2] : vector<1x8x8xf32> to vector<1x8xf32>
    %69 = vector.shape_cast %68 : vector<1x8xf32> to vector<1x8x1xf32>
    %70 = tpu.reciprocal %69 {approx = true} : vector<1x8x1xf32> -> vector<1x8x1xf32>
    %71 = vector.broadcast %70 : vector<1x8x1xf32> to vector<1x8x8xf32>
    %72 = arith.mulf %67, %71 : vector<1x8x8xf32>
    %73 = arith.truncf %72 : vector<1x8x8xf32> to vector<1x8x8xbf16>
    "tpu.trace_start"() <{level = 10 : i32, message = "bqk,bkd->bqd"}> : () -> ()
    %cst_22 = arith.constant dense<0.000000e+00> : vector<1x8x16xf32>
    %74 = tpu.matmul %73, %60, %cst_22 {dimension_numbers = #tpu.dot_dimension_numbers<[2], [1], [1], [2], [0, 0, 0, 1, 1, 2], [0], [0]>} : vector<1x8x8xbf16>, vector<1x8x16xbf16>, vector<1x8x16xf32> -> vector<1x8x16xf32>
    "tpu.trace_stop"() : () -> ()
    %75 = vector.extract_strided_slice %14 {offsets = [0, 0, 48], sizes = [1, 8, 16], strides = [1, 1, 1]} : vector<1x8x64xbf16> to vector<1x8x16xbf16>
    %76 = vector.extract_strided_slice %15 {offsets = [0, 0, 48], sizes = [1, 8, 16], strides = [1, 1, 1]} : vector<1x8x64xbf16> to vector<1x8x16xbf16>
    %77 = vector.extract_strided_slice %16 {offsets = [0, 0, 48], sizes = [1, 8, 16], strides = [1, 1, 1]} : vector<1x8x64xbf16> to vector<1x8x16xbf16>
    "tpu.trace_start"() <{level = 10 : i32, message = "bqd,bkd->bqk"}> : () -> ()
    %cst_23 = arith.constant dense<0.000000e+00> : vector<1x8x8xf32>
    %78 = tpu.matmul %75, %76, %cst_23 {dimension_numbers = #tpu.dot_dimension_numbers<[2], [2], [1], [1], [0, 0, 0, 1, 1, 1], [0], [0]>} : vector<1x8x16xbf16>, vector<1x8x16xbf16>, vector<1x8x8xf32> -> vector<1x8x8xf32>
    "tpu.trace_stop"() : () -> ()
    %79 = arith.addf %78, %23 : vector<1x8x8xf32>
    %cst_24 = arith.constant dense<0xFF800000> : vector<1x8xf32>
    %80 = vector.multi_reduction <maximumf>, %79, %cst_24 [2] : vector<1x8x8xf32> to vector<1x8xf32>
    %81 = vector.shape_cast %80 : vector<1x8xf32> to vector<1x8x1xf32>
    %82 = vector.broadcast %81 : vector<1x8x1xf32> to vector<1x8x8xf32>
    %83 = arith.subf %79, %82 : vector<1x8x8xf32>
    %84 = math.exp %83 : vector<1x8x8xf32>
    %cst_25 = arith.constant dense<0.000000e+00> : vector<1x8xf32>
    %85 = vector.multi_reduction <add>, %84, %cst_25 [2] : vector<1x8x8xf32> to vector<1x8xf32>
    %86 = vector.shape_cast %85 : vector<1x8xf32> to vector<1x8x1xf32>
    %87 = tpu.reciprocal %86 {approx = true} : vector<1x8x1xf32> -> vector<1x8x1xf32>
    %88 = vector.broadcast %87 : vector<1x8x1xf32> to vector<1x8x8xf32>
    %89 = arith.mulf %84, %88 : vector<1x8x8xf32>
    %90 = arith.truncf %89 : vector<1x8x8xf32> to vector<1x8x8xbf16>
    "tpu.trace_start"() <{level = 10 : i32, message = "bqk,bkd->bqd"}> : () -> ()
    %cst_26 = arith.constant dense<0.000000e+00> : vector<1x8x16xf32>
    %91 = tpu.matmul %90, %77, %cst_26 {dimension_numbers = #tpu.dot_dimension_numbers<[2], [1], [1], [2], [0, 0, 0, 1, 1, 2], [0], [0]>} : vector<1x8x8xbf16>, vector<1x8x16xbf16>, vector<1x8x16xf32> -> vector<1x8x16xf32>
    "tpu.trace_stop"() : () -> ()
    %92 = tpu.concatenate %40, %57, %74, %91 in 2 : vector<1x8x16xf32>, vector<1x8x16xf32>, vector<1x8x16xf32>, vector<1x8x16xf32> -> vector<1x8x64xf32>
    %93 = arith.truncf %92 : vector<1x8x64xf32> to vector<1x8x64xbf16>
    %c0_27 = arith.constant 0 : index
    %c0_28 = arith.constant 0 : index
    %c0_29 = arith.constant 0 : index
    %94 = vector.load %arg6[%c0_27, %c0_28, %c0_29] : memref<1x64x64xbf16, #tpu.memory_space<vmem>>, vector<1x64x64xbf16>
    %95 = vector.shape_cast %94 : vector<1x64x64xbf16> to vector<64x64xbf16>
    "tpu.trace_start"() <{level = 10 : i32, message = "bsd,de->bse"}> : () -> ()
    %cst_30 = arith.constant dense<0.000000e+00> : vector<1x8x64xf32>
    %96 = tpu.matmul %93, %95, %cst_30 {dimension_numbers = #tpu.dot_dimension_numbers<[2], [0], [0, 1], [1], [0, 0, 0, 1, 1, 1], [], []>} : vector<1x8x64xbf16>, vector<64x64xbf16>, vector<1x8x64xf32> -> vector<1x8x64xf32>
    "tpu.trace_stop"() : () -> ()
    %c0_31 = arith.constant 0 : index
    %c0_32 = arith.constant 0 : index
    %c0_33 = arith.constant 0 : index
    %97 = vector.load %arg7[%c0_31, %c0_32, %c0_33] : memref<1x1x64xf32, #tpu.memory_space<vmem>>, vector<1x1x64xf32>
    %98 = vector.shape_cast %97 : vector<1x1x64xf32> to vector<1x64xf32>
    %99 = vector.shape_cast %98 : vector<1x64xf32> to vector<1x1x64xf32>
    %100 = vector.broadcast %99 : vector<1x1x64xf32> to vector<1x8x64xf32>
    %101 = arith.addf %96, %100 : vector<1x8x64xf32>
    %102 = arith.addf %4, %101 : vector<1x8x64xf32>
    %c0_34 = arith.constant 0 : index
    %c0_35 = arith.constant 0 : index
    %c0_36 = arith.constant 0 : index
    %103 = vector.load %arg8[%c0_34, %c0_35, %c0_36] : memref<1x1x64xf32, #tpu.memory_space<vmem>>, vector<1x1x64xf32>
    %104 = vector.shape_cast %103 : vector<1x1x64xf32> to vector<1x64xf32>
    %c0_37 = arith.constant 0 : index
    %c0_38 = arith.constant 0 : index
    %c0_39 = arith.constant 0 : index
    %105 = vector.load %arg9[%c0_37, %c0_38, %c0_39] : memref<1x1x64xf32, #tpu.memory_space<vmem>>, vector<1x1x64xf32>
    %106 = vector.shape_cast %105 : vector<1x1x64xf32> to vector<1x64xf32>
    %cst_40 = arith.constant dense<0.000000e+00> : vector<1x8xf32>
    %107 = vector.multi_reduction <add>, %102, %cst_40 [2] : vector<1x8x64xf32> to vector<1x8xf32>
    %108 = vector.shape_cast %107 : vector<1x8xf32> to vector<1x8x1xf32>
    %cst_41 = arith.constant 6.400000e+01 : f32
    %109 = vector.broadcast %cst_41 : f32 to vector<1x8x1xf32>
    %110 = arith.divf %108, %109 : vector<1x8x1xf32>
    %111 = vector.broadcast %110 : vector<1x8x1xf32> to vector<1x8x64xf32>
    %112 = arith.subf %102, %111 : vector<1x8x64xf32>
    %113 = arith.mulf %112, %112 : vector<1x8x64xf32>
    %cst_42 = arith.constant dense<0.000000e+00> : vector<1x8xf32>
    %114 = vector.multi_reduction <add>, %113, %cst_42 [2] : vector<1x8x64xf32> to vector<1x8xf32>
    %115 = vector.shape_cast %114 : vector<1x8xf32> to vector<1x8x1xf32>
    %cst_43 = arith.constant 6.400000e+01 : f32
    %116 = vector.broadcast %cst_43 : f32 to vector<1x8x1xf32>
    %117 = arith.divf %115, %116 : vector<1x8x1xf32>
    %118 = vector.broadcast %110 : vector<1x8x1xf32> to vector<1x8x64xf32>
    %119 = arith.subf %102, %118 : vector<1x8x64xf32>
    %cst_44 = arith.constant 9.99999974E-6 : f32
    %120 = vector.broadcast %cst_44 : f32 to vector<1x8x1xf32>
    %121 = arith.addf %117, %120 : vector<1x8x1xf32>
    %122 = math.rsqrt %121 : vector<1x8x1xf32>
    %123 = vector.broadcast %122 : vector<1x8x1xf32> to vector<1x8x64xf32>
    %124 = arith.mulf %119, %123 : vector<1x8x64xf32>
    %125 = vector.shape_cast %104 : vector<1x64xf32> to vector<1x1x64xf32>
    %126 = vector.broadcast %125 : vector<1x1x64xf32> to vector<1x8x64xf32>
    %127 = arith.mulf %124, %126 : vector<1x8x64xf32>
    %128 = vector.shape_cast %106 : vector<1x64xf32> to vector<1x1x64xf32>
    %129 = vector.broadcast %128 : vector<1x1x64xf32> to vector<1x8x64xf32>
    %130 = arith.addf %127, %129 : vector<1x8x64xf32>
    %131 = arith.truncf %130 : vector<1x8x64xf32> to vector<1x8x64xbf16>
    %c0_45 = arith.constant 0 : index
    %c0_46 = arith.constant 0 : index
    %c0_47 = arith.constant 0 : index
    %132 = vector.load %arg10[%c0_45, %c0_46, %c0_47] : memref<1x64x256xbf16, #tpu.memory_space<vmem>>, vector<1x64x256xbf16>
    %133 = vector.shape_cast %132 : vector<1x64x256xbf16> to vector<64x256xbf16>
    "tpu.trace_start"() <{level = 10 : i32, message = "bsd,de->bse"}> : () -> ()
    %cst_48 = arith.constant dense<0.000000e+00> : vector<1x8x256xf32>
    %134 = tpu.matmul %131, %133, %cst_48 {dimension_numbers = #tpu.dot_dimension_numbers<[2], [0], [0, 1], [1], [0, 0, 0, 1, 1, 1], [], []>} : vector<1x8x64xbf16>, vector<64x256xbf16>, vector<1x8x256xf32> -> vector<1x8x256xf32>
    "tpu.trace_stop"() : () -> ()
    %c0_49 = arith.constant 0 : index
    %c0_50 = arith.constant 0 : index
    %c0_51 = arith.constant 0 : index
    %135 = vector.load %arg11[%c0_49, %c0_50, %c0_51] : memref<1x1x256xf32, #tpu.memory_space<vmem>>, vector<1x1x256xf32>
    %136 = vector.shape_cast %135 : vector<1x1x256xf32> to vector<1x256xf32>
    %137 = vector.shape_cast %136 : vector<1x256xf32> to vector<1x1x256xf32>
    %138 = vector.broadcast %137 : vector<1x1x256xf32> to vector<1x8x256xf32>
    %139 = arith.addf %134, %138 : vector<1x8x256xf32>
    %cst_52 = arith.constant 0.000000e+00 : f32
    %140 = vector.broadcast %cst_52 : f32 to vector<1x8x256xf32>
    %141 = arith.maximumf %139, %140 : vector<1x8x256xf32>
    %142 = arith.truncf %141 : vector<1x8x256xf32> to vector<1x8x256xbf16>
    %c0_53 = arith.constant 0 : index
    %c0_54 = arith.constant 0 : index
    %c0_55 = arith.constant 0 : index
    %143 = vector.load %arg12[%c0_53, %c0_54, %c0_55] : memref<1x256x64xbf16, #tpu.memory_space<vmem>>, vector<1x256x64xbf16>
    %144 = vector.shape_cast %143 : vector<1x256x64xbf16> to vector<256x64xbf16>
    "tpu.trace_start"() <{level = 10 : i32, message = "bse,ed->bsd"}> : () -> ()
    %cst_56 = arith.constant dense<0.000000e+00> : vector<1x8x64xf32>
    %145 = tpu.matmul %142, %144, %cst_56 {dimension_numbers = #tpu.dot_dimension_numbers<[2], [0], [0, 1], [1], [0, 0, 0, 1, 1, 1], [], []>} : vector<1x8x256xbf16>, vector<256x64xbf16>, vector<1x8x64xf32> -> vector<1x8x64xf32>
    "tpu.trace_stop"() : () -> ()
    %c0_57 = arith.constant 0 : index
    %c0_58 = arith.constant 0 : index
    %c0_59 = arith.constant 0 : index
    %146 = vector.load %arg13[%c0_57, %c0_58, %c0_59] : memref<1x1x64xf32, #tpu.memory_space<vmem>>, vector<1x1x64xf32>
    %147 = vector.shape_cast %146 : vector<1x1x64xf32> to vector<1x64xf32>
    %148 = vector.shape_cast %147 : vector<1x64xf32> to vector<1x1x64xf32>
    %149 = vector.broadcast %148 : vector<1x1x64xf32> to vector<1x8x64xf32>
    %150 = arith.addf %145, %149 : vector<1x8x64xf32>
    %151 = arith.addf %130, %150 : vector<1x8x64xf32>
    %c0_60 = arith.constant 0 : index
    %c0_61 = arith.constant 0 : index
    %c0_62 = arith.constant 0 : index
    %152 = vector.load %arg14[%c0_60, %c0_61, %c0_62] : memref<1x1x64xf32, #tpu.memory_space<vmem>>, vector<1x1x64xf32>
    %153 = vector.shape_cast %152 : vector<1x1x64xf32> to vector<1x64xf32>
    %c0_63 = arith.constant 0 : index
    %c0_64 = arith.constant 0 : index
    %c0_65 = arith.constant 0 : index
    %154 = vector.load %arg15[%c0_63, %c0_64, %c0_65] : memref<1x1x64xf32, #tpu.memory_space<vmem>>, vector<1x1x64xf32>
    %155 = vector.shape_cast %154 : vector<1x1x64xf32> to vector<1x64xf32>
    %cst_66 = arith.constant dense<0.000000e+00> : vector<1x8xf32>
    %156 = vector.multi_reduction <add>, %151, %cst_66 [2] : vector<1x8x64xf32> to vector<1x8xf32>
    %157 = vector.shape_cast %156 : vector<1x8xf32> to vector<1x8x1xf32>
    %cst_67 = arith.constant 6.400000e+01 : f32
    %158 = vector.broadcast %cst_67 : f32 to vector<1x8x1xf32>
    %159 = arith.divf %157, %158 : vector<1x8x1xf32>
    %160 = vector.broadcast %159 : vector<1x8x1xf32> to vector<1x8x64xf32>
    %161 = arith.subf %151, %160 : vector<1x8x64xf32>
    %162 = arith.mulf %161, %161 : vector<1x8x64xf32>
    %cst_68 = arith.constant dense<0.000000e+00> : vector<1x8xf32>
    %163 = vector.multi_reduction <add>, %162, %cst_68 [2] : vector<1x8x64xf32> to vector<1x8xf32>
    %164 = vector.shape_cast %163 : vector<1x8xf32> to vector<1x8x1xf32>
    %cst_69 = arith.constant 6.400000e+01 : f32
    %165 = vector.broadcast %cst_69 : f32 to vector<1x8x1xf32>
    %166 = arith.divf %164, %165 : vector<1x8x1xf32>
    %167 = vector.broadcast %159 : vector<1x8x1xf32> to vector<1x8x64xf32>
    %168 = arith.subf %151, %167 : vector<1x8x64xf32>
    %cst_70 = arith.constant 9.99999974E-6 : f32
    %169 = vector.broadcast %cst_70 : f32 to vector<1x8x1xf32>
    %170 = arith.addf %166, %169 : vector<1x8x1xf32>
    %171 = math.rsqrt %170 : vector<1x8x1xf32>
    %172 = vector.broadcast %171 : vector<1x8x1xf32> to vector<1x8x64xf32>
    %173 = arith.mulf %168, %172 : vector<1x8x64xf32>
    %174 = vector.shape_cast %153 : vector<1x64xf32> to vector<1x1x64xf32>
    %175 = vector.broadcast %174 : vector<1x1x64xf32> to vector<1x8x64xf32>
    %176 = arith.mulf %173, %175 : vector<1x8x64xf32>
    %177 = vector.shape_cast %155 : vector<1x64xf32> to vector<1x1x64xf32>
    %178 = vector.broadcast %177 : vector<1x1x64xf32> to vector<1x8x64xf32>
    %179 = arith.addf %176, %178 : vector<1x8x64xf32>
    %180 = arith.truncf %179 : vector<1x8x64xf32> to vector<1x8x64xbf16>
    %c0_71 = arith.constant 0 : index
    %c0_72 = arith.constant 0 : index
    %c0_73 = arith.constant 0 : index
    %181 = vector.load %arg27[%c0_71, %c0_72, %c0_73] : memref<1x8x64xbf16, #tpu.memory_space<vmem>>, vector<1x8x64xbf16>
    tpu.vector_store %arg27[%c0_71, %c0_72, %c0_73], %180 {strides = array<i32>} : memref<1x8x64xbf16, #tpu.memory_space<vmem>>, vector<1x8x64xbf16>,
    %c1_i32 = arith.constant 1 : i32
    %182 = arith.cmpi eq, %arg1, %c1_i32 : i32
    %183 = arith.extui %182 : i1 to i32
    %c0_i32_74 = arith.constant 0 : i32
    %184 = arith.cmpi ne, %183, %c0_i32_74 : i32
    scf.if %184 {
      %c0_75 = arith.constant 0 : index
      %c0_76 = arith.constant 0 : index
      %c0_77 = arith.constant 0 : index
      %185 = vector.load %arg27[%c0_75, %c0_76, %c0_77] : memref<1x8x64xbf16, #tpu.memory_space<vmem>>, vector<1x8x64xbf16>
      %c0_78 = arith.constant 0 : index
      %c0_79 = arith.constant 0 : index
      %186 = vector.load %arg16[%c0_78, %c0_79] : memref<64x128xbf16, #tpu.memory_space<vmem>>, vector<64x128xbf16>
      "tpu.trace_start"() <{level = 10 : i32, message = "bsd,dg->bsg"}> : () -> ()
      %cst_80 = arith.constant dense<0.000000e+00> : vector<1x8x128xf32>
      %187 = tpu.matmul %185, %186, %cst_80 {dimension_numbers = #tpu.dot_dimension_numbers<[2], [0], [0, 1], [1], [0, 0, 0, 1, 1, 1], [], []>} : vector<1x8x64xbf16>, vector<64x128xbf16>, vector<1x8x128xf32> -> vector<1x8x128xf32>
      "tpu.trace_stop"() : () -> ()
      %c0_81 = arith.constant 0 : index
      %c0_82 = arith.constant 0 : index
      %188 = vector.load %arg17[%c0_81, %c0_82] : memref<1x128xf32, #tpu.memory_space<vmem>>, vector<1x128xf32>
      %189 = vector.shape_cast %188 : vector<1x128xf32> to vector<1x1x128xf32>
      %190 = vector.broadcast %189 : vector<1x1x128xf32> to vector<1x8x128xf32>
      %191 = arith.addf %187, %190 : vector<1x8x128xf32>
      %cst_83 = arith.constant 0.000000e+00 : f32
      %192 = vector.broadcast %cst_83 : f32 to vector<1x8x128xf32>
      %193 = arith.maximumf %191, %192 : vector<1x8x128xf32>
      %194 = arith.truncf %193 : vector<1x8x128xf32> to vector<1x8x128xbf16>
      %c0_84 = arith.constant 0 : index
      %c0_85 = arith.constant 0 : index
      %195 = vector.load %arg18[%c0_84, %c0_85] : memref<128x64xbf16, #tpu.memory_space<vmem>>, vector<128x64xbf16>
      "tpu.trace_start"() <{level = 10 : i32, message = "bsg,gd->bsd"}> : () -> ()
      %cst_86 = arith.constant dense<0.000000e+00> : vector<1x8x64xf32>
      %196 = tpu.matmul %194, %195, %cst_86 {dimension_numbers = #tpu.dot_dimension_numbers<[2], [0], [0, 1], [1], [0, 0, 0, 1, 1, 1], [], []>} : vector<1x8x128xbf16>, vector<128x64xbf16>, vector<1x8x64xf32> -> vector<1x8x64xf32>
      "tpu.trace_stop"() : () -> ()
      %c0_87 = arith.constant 0 : index
      %c0_88 = arith.constant 0 : index
      %197 = vector.load %arg19[%c0_87, %c0_88] : memref<1x64xf32, #tpu.memory_space<vmem>>, vector<1x64xf32>
      %198 = vector.shape_cast %197 : vector<1x64xf32> to vector<1x1x64xf32>
      %199 = vector.broadcast %198 : vector<1x1x64xf32> to vector<1x8x64xf32>
      %200 = arith.addf %196, %199 : vector<1x8x64xf32>
      %c0_89 = arith.constant 0 : index
      %c0_90 = arith.constant 0 : index
      %c0_91 = arith.constant 0 : index
      %201 = vector.load %arg25[%c0_89, %c0_90, %c0_91] : memref<1x8x64xf32, #tpu.memory_space<vmem>>, vector<1x8x64xf32>
      tpu.vector_store %arg25[%c0_89, %c0_90, %c0_91], %200 {strides = array<i32>} : memref<1x8x64xf32, #tpu.memory_space<vmem>>, vector<1x8x64xf32>,
      %202 = vector.extract_strided_slice %185 {offsets = [0, 0, 0], sizes = [1, 7, 64], strides = [1, 1, 1]} : vector<1x8x64xbf16> to vector<1x7x64xbf16>
      %203 = vector.extract_strided_slice %185 {offsets = [0, 1, 0], sizes = [1, 7, 64], strides = [1, 1, 1]} : vector<1x8x64xbf16> to vector<1x7x64xbf16>
      %c0_92 = arith.constant 0 : index
      %c0_93 = arith.constant 0 : index
      %204 = vector.load %arg20[%c0_92, %c0_93] : memref<64x64xbf16, #tpu.memory_space<vmem>>, vector<64x64xbf16>
      "tpu.trace_start"() <{level = 10 : i32, message = "bsd,de->bse"}> : () -> ()
      %cst_94 = arith.constant dense<0.000000e+00> : vector<1x7x64xf32>
      %205 = tpu.matmul %202, %204, %cst_94 {dimension_numbers = #tpu.dot_dimension_numbers<[2], [0], [0, 1], [1], [0, 0, 0, 1, 1, 1], [], []>} : vector<1x7x64xbf16>, vector<64x64xbf16>, vector<1x7x64xf32> -> vector<1x7x64xf32>
      "tpu.trace_stop"() : () -> ()
      %c0_95 = arith.constant 0 : index
      %c0_96 = arith.constant 0 : index
      %206 = vector.load %arg21[%c0_95, %c0_96] : memref<64x64xbf16, #tpu.memory_space<vmem>>, vector<64x64xbf16>
      "tpu.trace_start"() <{level = 10 : i32, message = "bsd,de->bse"}> : () -> ()
      %cst_97 = arith.constant dense<0.000000e+00> : vector<1x7x64xf32>
      %207 = tpu.matmul %203, %206, %cst_97 {dimension_numbers = #tpu.dot_dimension_numbers<[2], [0], [0, 1], [1], [0, 0, 0, 1, 1, 1], [], []>} : vector<1x7x64xbf16>, vector<64x64xbf16>, vector<1x7x64xf32> -> vector<1x7x64xf32>
      "tpu.trace_stop"() : () -> ()
      %208 = arith.addf %205, %207 : vector<1x7x64xf32>
      %c0_98 = arith.constant 0 : index
      %c0_99 = arith.constant 0 : index
      %209 = vector.load %arg22[%c0_98, %c0_99] : memref<1x64xf32, #tpu.memory_space<vmem>>, vector<1x64xf32>
      %210 = vector.shape_cast %209 : vector<1x64xf32> to vector<1x1x64xf32>
      %211 = vector.broadcast %210 : vector<1x1x64xf32> to vector<1x7x64xf32>
      %212 = arith.addf %208, %211 : vector<1x7x64xf32>
      %cst_100 = arith.constant 0.000000e+00 : f32
      %213 = vector.broadcast %cst_100 : f32 to vector<1x7x64xf32>
      %214 = arith.maximumf %212, %213 : vector<1x7x64xf32>
      %c0_101 = arith.constant 0 : index
      %c0_102 = arith.constant 0 : index
      %215 = vector.load %arg23[%c0_101, %c0_102] : memref<1x64xf32, #tpu.memory_space<vmem>>, vector<1x64xf32>
      %216 = vector.shape_cast %215 : vector<1x64xf32> to vector<1x1x64xf32>
      %217 = vector.broadcast %216 : vector<1x1x64xf32> to vector<1x7x64xf32>
      %218 = arith.mulf %214, %217 : vector<1x7x64xf32>
      %cst_103 = arith.constant dense<0.000000e+00> : vector<1x7xf32>
      %219 = vector.multi_reduction <add>, %218, %cst_103 [2] : vector<1x7x64xf32> to vector<1x7xf32>
      %c0_104 = arith.constant 0 : index
      %c0_105 = arith.constant 0 : index
      %220 = vector.load %arg24[%c0_104, %c0_105] : memref<1x1xf32, #tpu.memory_space<vmem>>, vector<1x1xf32>
      %221 = vector.broadcast %220 : vector<1x1xf32> to vector<1x7xf32>
      %222 = arith.addf %219, %221 : vector<1x7xf32>
      %223 = arith.negf %222 : vector<1x7xf32>
      %224 = math.exp %223 : vector<1x7xf32>
      %cst_106 = arith.constant 1.000000e+00 : f32
      %225 = vector.broadcast %cst_106 : f32 to vector<1x7xf32>
      %226 = arith.addf %225, %224 : vector<1x7xf32>
      %227 = arith.divf %225, %226 : vector<1x7xf32>
      %228 = vector.shape_cast %227 : vector<1x7xf32> to vector<1x1x7xf32>
      %c0_107 = arith.constant 0 : index
      %c0_108 = arith.constant 0 : index
      %c0_109 = arith.constant 0 : index
      %229 = vector.load %arg26[%c0_107, %c0_108, %c0_109] : memref<1x1x7xf32, #tpu.memory_space<vmem>>, vector<1x1x7xf32>
      tpu.vector_store %arg26[%c0_107, %c0_108, %c0_109], %228 {strides = array<i32>} : memref<1x1x7xf32, #tpu.memory_space<vmem>>, vector<1x1x7xf32>,
    } else {
    }
    return
  }
  func.func @transform_0(%arg0: i32, %arg1: i32) -> (i32, i32, i32) {
    %c0_i32 = arith.constant 0 : i32
    %c0_i32_0 = arith.constant 0 : i32
    %c0_i32_1 = arith.constant 0 : i32
    return %arg0, %c0_i32, %c0_i32_0 : i32, i32, i32
  }
  func.func @transform_1(%arg0: i32, %arg1: i32) -> (i32, i32) {
    %c0_i32 = arith.constant 0 : i32
    %c0_i32_0 = arith.constant 0 : i32
    %c0_i32_1 = arith.constant 0 : i32
    return %c0_i32, %c0_i32_0 : i32, i32
  }
  func.func @transform_2(%arg0: i32, %arg1: i32) -> (i32, i32, i32) {
    %c0_i32 = arith.constant 0 : i32
    %c0_i32_0 = arith.constant 0 : i32
    %c0_i32_1 = arith.constant 0 : i32
    return %arg1, %c0_i32, %c0_i32_0 : i32, i32, i32
  }
  func.func @transform_3(%arg0: i32, %arg1: i32) -> (i32, i32, i32) {
    %c0_i32 = arith.constant 0 : i32
    %c0_i32_0 = arith.constant 0 : i32
    %c0_i32_1 = arith.constant 0 : i32
    return %arg1, %c0_i32, %c0_i32_0 : i32, i32, i32
  }
  func.func @transform_4(%arg0: i32, %arg1: i32) -> (i32, i32, i32) {
    %c0_i32 = arith.constant 0 : i32
    %c0_i32_0 = arith.constant 0 : i32
    %c0_i32_1 = arith.constant 0 : i32
    return %arg1, %c0_i32, %c0_i32_0 : i32, i32, i32
  }
  func.func @transform_5(%arg0: i32, %arg1: i32) -> (i32, i32, i32) {
    %c0_i32 = arith.constant 0 : i32
    %c0_i32_0 = arith.constant 0 : i32
    %c0_i32_1 = arith.constant 0 : i32
    return %arg1, %c0_i32, %c0_i32_0 : i32, i32, i32
  }
  func.func @transform_6(%arg0: i32, %arg1: i32) -> (i32, i32, i32) {
    %c0_i32 = arith.constant 0 : i32
    %c0_i32_0 = arith.constant 0 : i32
    %c0_i32_1 = arith.constant 0 : i32
    return %arg1, %c0_i32, %c0_i32_0 : i32, i32, i32
  }
  func.func @transform_7(%arg0: i32, %arg1: i32) -> (i32, i32, i32) {
    %c0_i32 = arith.constant 0 : i32
    %c0_i32_0 = arith.constant 0 : i32
    %c0_i32_1 = arith.constant 0 : i32
    return %arg1, %c0_i32, %c0_i32_0 : i32, i32, i32
  }
  func.func @transform_8(%arg0: i32, %arg1: i32) -> (i32, i32, i32) {
    %c0_i32 = arith.constant 0 : i32
    %c0_i32_0 = arith.constant 0 : i32
    %c0_i32_1 = arith.constant 0 : i32
    return %arg1, %c0_i32, %c0_i32_0 : i32, i32, i32
  }
  func.func @transform_9(%arg0: i32, %arg1: i32) -> (i32, i32, i32) {
    %c0_i32 = arith.constant 0 : i32
    %c0_i32_0 = arith.constant 0 : i32
    %c0_i32_1 = arith.constant 0 : i32
    return %arg1, %c0_i32, %c0_i32_0 : i32, i32, i32
  }
  func.func @transform_10(%arg0: i32, %arg1: i32) -> (i32, i32, i32) {
    %c0_i32 = arith.constant 0 : i32
    %c0_i32_0 = arith.constant 0 : i32
    %c0_i32_1 = arith.constant 0 : i32
    return %arg1, %c0_i32, %c0_i32_0 : i32, i32, i32
  }
  func.func @transform_11(%arg0: i32, %arg1: i32) -> (i32, i32, i32) {
    %c0_i32 = arith.constant 0 : i32
    %c0_i32_0 = arith.constant 0 : i32
    %c0_i32_1 = arith.constant 0 : i32
    return %arg1, %c0_i32, %c0_i32_0 : i32, i32, i32
  }
  func.func @transform_12(%arg0: i32, %arg1: i32) -> (i32, i32, i32) {
    %c0_i32 = arith.constant 0 : i32
    %c0_i32_0 = arith.constant 0 : i32
    %c0_i32_1 = arith.constant 0 : i32
    return %arg1, %c0_i32, %c0_i32_0 : i32, i32, i32
  }
  func.func @transform_13(%arg0: i32, %arg1: i32) -> (i32, i32, i32) {
    %c0_i32 = arith.constant 0 : i32
    %c0_i32_0 = arith.constant 0 : i32
    %c0_i32_1 = arith.constant 0 : i32
    return %arg1, %c0_i32, %c0_i32_0 : i32, i32, i32
  }
  func.func @transform_14(%arg0: i32, %arg1: i32) -> (i32, i32) {
    %c0_i32 = arith.constant 0 : i32
    %c0_i32_0 = arith.constant 0 : i32
    %c0_i32_1 = arith.constant 0 : i32
    return %c0_i32, %c0_i32_0 : i32, i32
  }
  func.func @transform_15(%arg0: i32, %arg1: i32) -> (i32, i32) {
    %c0_i32 = arith.constant 0 : i32
    %c0_i32_0 = arith.constant 0 : i32
    %c0_i32_1 = arith.constant 0 : i32
    return %c0_i32, %c0_i32_0 : i32, i32
  }
  func.func @transform_16(%arg0: i32, %arg1: i32) -> (i32, i32) {
    %c0_i32 = arith.constant 0 : i32
    %c0_i32_0 = arith.constant 0 : i32
    %c0_i32_1 = arith.constant 0 : i32
    return %c0_i32, %c0_i32_0 : i32, i32
  }
  func.func @transform_17(%arg0: i32, %arg1: i32) -> (i32, i32) {
    %c0_i32 = arith.constant 0 : i32
    %c0_i32_0 = arith.constant 0 : i32
    %c0_i32_1 = arith.constant 0 : i32
    return %c0_i32, %c0_i32_0 : i32, i32
  }
  func.func @transform_18(%arg0: i32, %arg1: i32) -> (i32, i32) {
    %c0_i32 = arith.constant 0 : i32
    %c0_i32_0 = arith.constant 0 : i32
    %c0_i32_1 = arith.constant 0 : i32
    return %c0_i32, %c0_i32_0 : i32, i32
  }
  func.func @transform_19(%arg0: i32, %arg1: i32) -> (i32, i32) {
    %c0_i32 = arith.constant 0 : i32
    %c0_i32_0 = arith.constant 0 : i32
    %c0_i32_1 = arith.constant 0 : i32
    return %c0_i32, %c0_i32_0 : i32, i32
  }
  func.func @transform_20(%arg0: i32, %arg1: i32) -> (i32, i32) {
    %c0_i32 = arith.constant 0 : i32
    %c0_i32_0 = arith.constant 0 : i32
    %c0_i32_1 = arith.constant 0 : i32
    return %c0_i32, %c0_i32_0 : i32, i32
  }
  func.func @transform_21(%arg0: i32, %arg1: i32) -> (i32, i32) {
    %c0_i32 = arith.constant 0 : i32
    %c0_i32_0 = arith.constant 0 : i32
    %c0_i32_1 = arith.constant 0 : i32
    return %c0_i32, %c0_i32_0 : i32, i32
  }
  func.func @transform_22(%arg0: i32, %arg1: i32) -> (i32, i32) {
    %c0_i32 = arith.constant 0 : i32
    %c0_i32_0 = arith.constant 0 : i32
    %c0_i32_1 = arith.constant 0 : i32
    return %c0_i32, %c0_i32_0 : i32, i32
  }
  func.func @transform_23(%arg0: i32, %arg1: i32) -> (i32, i32, i32) {
    %c0_i32 = arith.constant 0 : i32
    %c0_i32_0 = arith.constant 0 : i32
    %c0_i32_1 = arith.constant 0 : i32
    return %arg0, %c0_i32, %c0_i32_0 : i32, i32, i32
  }
  func.func @transform_24(%arg0: i32, %arg1: i32) -> (i32, i32, i32) {
    %c0_i32 = arith.constant 0 : i32
    %c0_i32_0 = arith.constant 0 : i32
    %c0_i32_1 = arith.constant 0 : i32
    return %arg0, %c0_i32, %c0_i32_0 : i32, i32, i32
  }
}

</mosaic_0001>

<bundles_post_ra>
// kernel: causal_transformer_forward.1
= control target key start
LH: loop header
LB: loop body
LE: loop exit
PB: predicated region body
PF: predicated region fallthrough
CT: control target
= control target key end

     0   :  { %s4279_s0 = inlined_call_operand.vmem [shape: f32[2,8,64], index: 0, kind: input, shape index: {}]   ;;  %s4280_s1 = inlined_call_operand.vmem [shape: f32[8,64], index: 1, kind: input, shape index: {}]   ;;  %s4281_s2 = inlined_call_operand.vmem [shape: bf16[2,64,192], index: 2, kind: input, shape index: {}]   ;;  %s4282_s3 = inlined_call_operand.vmem [shape: f32[2,1,192], index: 3, kind: input, shape index: {}]   ;;  %s4283_s4 = inlined_call_operand.vmem [shape: bf16[2,64,64], index: 4, kind: input, shape index: {}]   ;;  %s4284_s5 = inlined_call_operand.vmem [shape: f32[2,1,64], index: 5, kind: input, shape index: {}]   ;;  %s4285_s6 = inlined_call_operand.vmem [shape: f32[2,1,64], index: 6, kind: input, shape index: {}]   ;;  %s4286_s7 = inlined_call_operand.hbm [shape: f32[2,1,64], index: 7, kind: input, shape index: {}]   ;;  %s4287_s8 = inlined_call_operand.vmem [shape: bf16[2,64,256], index: 8, kind: input, shape index: {}]   ;;  %s4288_s9 = inlined_call_operand.vmem [shape: f32[2,1,256], index: 9, kind: input, shape index: {}]   ;;  %s4289_s10 = inlined_call_operand.vmem [shape: bf16[2,256,64], index: 10, kind: input, shape index: {}]   ;;  %s4290_s11 = inlined_call_operand.hbm [shape: f32[2,1,64], index: 11, kind: input, shape index: {}]   ;;  %s4291_s12 = inlined_call_operand.hbm [shape: f32[2,1,64], index: 12, kind: input, shape index: {}]   ;;  %s4292_s13 = inlined_call_operand.hbm [shape: f32[2,1,64], index: 13, kind: input, shape index: {}]   ;;  %s4293_s14 = inlined_call_operand.vmem [shape: bf16[64,128], index: 14, kind: input, shape index: {}]   ;;  %s4294_s15 = inlined_call_operand.hbm [shape: f32[1,128], index: 15, kind: input, shape index: {}]   ;;  %s4295_s16 = inlined_call_operand.vmem [shape: bf16[128,64], index: 16, kind: input, shape index: {}]   ;;  %s4296_s17 = inlined_call_operand.hbm [shape: f32[1,64], index: 17, kind: input, shape index: {}]   ;;  %s4297_s18 = inlined_call_operand.hbm [shape: bf16[64,64], index: 18, kind: input, shape index: {}]   ;;  %s4298_s19 = inlined_call_operand.hbm [shape: bf16[64,64], index: 19, kind: input, shape index: {}]   ;;  %s4299_s20 = inlined_call_operand.hbm [shape: f32[1,64], index: 20, kind: input, shape index: {}]   ;;  %s4300_s21 = inlined_call_operand.hbm [shape: f32[1,64], index: 21, kind: input, shape index: {}]   ;;  %s4301_s22 = inlined_call_operand.<no memory space> [shape: f32[1,1], index: 22, kind: input, shape index: {}]   ;;  %s4302_s23 = inlined_call_operand.hbm [shape: f32[2,8,64], index: 23, kind: output, shape index: {0}]   ;;  %s4303_s24 = inlined_call_operand.hbm [shape: f32[2,1,7], index: 24, kind: output, shape index: {1}]  }
   0x1   :  { %4327 = sst [smem:[#allocation48_spill]] %s4279_s0  ;;  %v30_v0 = vstv %s4301_s22 }
   0x2   :  { %4328 = sst [smem:[#allocation49_spill]] %s4280_s1  ;;  %31 = vst [vmem:[#allocation3] sm:$0x1] %v30_v0 }
   0x3   :  { %4329 = sst [smem:[#allocation50_spill]] %s4281_s2 }
   0x4   :  { %4330 = sst [smem:[#allocation51_spill]] %s4282_s3 }
   0x5   :  { %4331 = sst [smem:[#allocation52_spill]] %s4283_s4 }
   0x6   :  { %4332 = sst [smem:[#allocation53_spill]] %s4284_s5 }
   0x7   :  { %4333 = sst [smem:[#allocation54_spill]] %s4285_s6 }
   0x8   :  { %4334 = sst [smem:[#allocation55_spill]] %s4286_s7 }
   0x9   :  { %4335 = sst [smem:[#allocation56_spill]] %s4287_s8 }
   0xa   :  { %4336 = sst [smem:[#allocation57_spill]] %s4288_s9 }
   0xb   :  { %4337 = sst [smem:[#allocation58_spill]] %s4289_s10 }
   0xc   :  { %4338 = sst [smem:[#allocation59_spill]] %s4290_s11 }
   0xd   :  { %4339 = sst [smem:[#allocation60_spill]] %s4291_s12 }
   0xe   :  { %4340 = sst [smem:[#allocation61_spill]] %s4292_s13 }
   0xf   :  { %4341 = sst [smem:[#allocation62_spill]] %s4293_s14 }
  0x10   :  { %4342 = sst [smem:[#allocation63_spill]] %s4294_s15 }
  0x11   :  { %4343 = sst [smem:[#allocation64_spill]] %s4295_s16 }
  0x12   :  { %4344 = sst [smem:[#allocation65_spill]] %s4296_s17 }
  0x13   :  { %4345 = sst [smem:[#allocation66_spill]] %s4297_s18 }
  0x14   :  { %4346 = sst [smem:[#allocation67_spill]] %s4298_s19 }
  0x15   :  { %4347 = sst [smem:[#allocation68_spill]] %s4299_s20 }
  0x16   :  { %4348 = sst [smem:[#allocation69_spill]] %s4300_s21 }
  0x17   :  { %4349 = sst [smem:[#allocation70_spill]] %s4302_s23 }
  0x18   :  { %4350 = sst [smem:[#allocation71_spill]] %s4303_s24 }
  0x19   :  { %32 = vsyncpa [#allocation5], 0 }
  0x1a   :  { %34 = vsyncpa [#allocation5 + $0x1], 0 }
  0x1b   :  { %35 = vsyncpa [#allocation8], 0 }
  0x1c   :  { %37 = vsyncpa [#allocation8 + $0x1], 0 }
  0x1d   :  { %38 = vsyncpa [#allocation11], 0 }
  0x1e   :  { %40 = vsyncpa [#allocation11 + $0x1], 0 }
  0x1f   :  { %41 = vsyncpa [#allocation14], 0 }
  0x20   :  { %42 = vsyncpa [#allocation17], 0 }
  0x21   :  { %43 = vsyncpa [#allocation20], 0 }
  0x22   :  { %44 = vsyncpa [#allocation6], 0 }
  0x23   :  { %46 = vsyncpa [#allocation6 + $0x1], 0 }
  0x24   :  { %47 = vsyncpa [#allocation23], 0 }
  0x25   :  { %49 = vsyncpa [#allocation23 + $0x1], 0  ;;  %s3695_s27 = smov 0   ;;  %s3697_s28 = smov 0  }
  0x26   :  { %s3699_s6 = smov 0   ;;  %s3701_s22 = smov 0  }
  0x27   :  { %s3703_s2 = smov 0   ;;  %s3705_s29 = smov 0  }
  0x28   :  { %s3707_s0 = smov 0   ;;  %s3709_s7 = smov 0  }
  0x29   :  { %s3711_s30 = smov 0   ;;  %s3713_s3 = smov 0  }
  0x2a   :  { %s3715_s25 = smov 0  }
  0x2b LB: > { %4351 = sst [smem:[#allocation33_spill]] %s3507_s27  ;;  %s3751_s8 = sadd.s32 4294967295, %s3547_s25   ;;  %s3547_s25 = sphi %s3715_s25, %s55_s25   ;;  %s3543_s3 = sphi %s3713_s3, %s4422_s3   ;;  %s3539_s30 = sphi %s3711_s30, %s4421_s30   ;;  %s3535_s7 = sphi %s3709_s7, %s4420_s7   ;;  %s3531_s0 = sphi %s3707_s0, %s4419_s0   ;;  %s3527_s29 = sphi %s3705_s29, %s4418_s29   ;;  %s3523_s2 = sphi %s3703_s2, %s4417_s2   ;;  %s3519_s22 = sphi %s3701_s22, %s4416_s22   ;;  %s3515_s6 = sphi %s3699_s6, %s4415_s6   ;;  %s3511_s28 = sphi %s3697_s28, %s4414_s28   ;;  %s3507_s27 = sphi %s3695_s27, %s4413_s27  }
  0x2c   : > { %4352 = sst [smem:[#allocation34_spill]] %s3511_s28  ;;  %s2502_s4 = sadd.s32 4294967294, %s3547_s25  }
  0x2d   : > { %4353 = sst [smem:[#allocation35_spill]] %s3515_s6  ;;  %p265_p0 = scmp.eq.s32.totalorder %s3751_s8, 0 }
  0x2e   : > { %4354 = sst [smem:[#allocation36_spill]] %s3523_s2  ;;  %p632_p1 = scmp.ne.s32.totalorder %s3515_s6, %s3511_s28 }
  0x2f   : > { %4355 = sst [smem:[#allocation37_spill]] %s3527_s29  ;;  %p633_p2 = scmp.eq.s32.totalorder %s3751_s8, 3 }
  0x30   : > { %4356 = sst [smem:[#allocation38_spill]] %s3535_s7  ;;  %p638_p3 = scmp.ne.s32.totalorder %s3511_s28, %s3507_s27 }
  0x31   : > { %4357 = sst [smem:[#allocation39_spill]] %s3539_s30  ;;  %p639_p4 = scmp.eq.s32.totalorder %s2502_s4, 3 }
  0x32   : > { %4358 = sst [smem:[#allocation40_spill]] %s3543_s3  ;;  %p2503_p5 = scmp.ge.s32.totalorder %s3547_s25, 1 }
  0x33   : > { %4359 = sst [smem:[#allocation41_spill]] %s3547_s25  ;;  %p3761_p6 = por %p633_p2, %p632_p1 }
  0x34   : > { %p672_p7 = scmp.lt.s32.totalorder %s3547_s25, 5  ;;  %p3766_p8 = por %p639_p4, %p638_p3 }
  0x35   : > { %s4360_s1 = scalar_select %p3761_p6, 1, 0 }
  0x36   : > { %s4362_s5 = scalar_select %p3766_p8, 1, 0 }
  0x37   : > { %4361 = sst [smem:[#allocation42_spill]] %s4360_s1  ;;  %p3770_p9 = pnand %p2503_p5, %p672_p7 }
  0x38   : > { %4363 = sst [smem:[#allocation43_spill]] %s4362_s5  ;;  %s3549_s4 = smov [#allocation12]  }
  0x39   : > { %s4365_s15 = sld [smem:[#allocation63_spill]]  ;;  %p2873_p10 = pneg %p3770_p9 }
  0x3a   : > { %s692_s16 = sshll.u32 %s3549_s4, 4  ;;  %s4367_s17 = sld [smem:[#allocation65_spill]]  ;;  %s693_s16 = int_to_ptr.vmem [resolvable:$true] %s692_s16 }
  0x3b   : > { %p3781_p11 = pnand %p2873_p10, %p265_p0  ;;  %s3550_s24 = smov [#allocation13]  }
  0x3c   : > { %s4368_s19 = sld [smem:[#allocation67_spill]]  ;;  %s4313_s9 = smov 4  }
  0x3d   : > { %p258_p13 = scmp.ne.s32.totalorder %s3527_s29, %s3523_s2  ;;  %p259_p1 = scmp.eq.s32.totalorder %s3547_s25, 0 }
  0x3e   : > { %p264_p5 = scmp.ne.s32.totalorder %s3523_s2, %s3519_s22  ;;  %s4376_s11 = sld [smem:[#allocation59_spill]] }
  0x3f   : > { %s690_s27 = sshll.u32 %s4365_s15, 4  ;;  %s707_s15 = sshll.u32 %s3550_s24, 4  ;;  %s691_s27 = int_to_ptr.hbm [resolvable:$true] %s690_s27  ;;  %s708_s15 = int_to_ptr.vmem [resolvable:$true] %s707_s15 }
  0x40   : > { %s705_s23 = sshll.u32 %s4367_s17, 4  ;;  %s3551_s17 = smov [#allocation16]   ;;  %s706_s23 = int_to_ptr.hbm [resolvable:$true] %s705_s23 }
  0x41   : > { %2876 = dma.hbm_to_vmem [thread:$0]  (!%p3781_p11), %s691_s27, 16, %s693_s16, [#allocation11]  }
  0x42   : > { %2879 = dma.hbm_to_vmem [thread:$0]  (!%p3781_p11), %s706_s23, 16, %s708_s15, [#allocation14]  }
  0x43   : > { %s730_s5 = sshll.u32 %s4368_s19, 4  ;;  %s732_s10 = sshll.u32 %s3551_s17, 4  ;;  %s731_s5 = int_to_ptr.hbm [resolvable:$true] %s730_s5  ;;  %s733_s10 = int_to_ptr.vmem [resolvable:$true] %s732_s10 }
  0x44   : > { %s4312_s24 = smov 64   ;;  %s64_s15 = sadd.s32 1, %s3539_s30 }
  0x45   : > { %2885 = dma.hbm_to_vmem [thread:$0]  (!%p3781_p11), %s731_s5, 512, %s733_s10, [#allocation17], %s4312_s24, %s4312_s24, %s4313_s9  }
  0x46   : > { %s67_s16 = sadd.s32 1, %s3543_s3  ;;  %p65_p12 = scmp.ge.s32.totalorder %s64_s15, 2 }
  0x47   : > { %s251_s27 = sadd.s32 1, %s3527_s29  ;;  %p3811_p2 = por %p259_p1, %p258_p13 }
  0x48   : > { %s4424_s15 = smov (%p65_p12, %s64_s15), 0  ;;  %s4426_s16 = smov (!%p65_p12, %s67_s16), %s3543_s3 }
  0x49   : > { %4369 = sst [smem:[#allocation44_spill]] %s4424_s15  ;;  %s248_s17 = ssub.s32 %s3539_s30, %s4424_s15 }
  0x4a   : > { %p69_p3 = scmp.ge.s32.totalorder %s4426_s16, 2  ;;  %p249_p4 = scmp.eq.s32.totalorder %s248_s17, 0 }
  0x4b   : > { %s622_s23 = sadd.s32 1, %s3515_s6  ;;  %p3825_p7 = por %p265_p0, %p264_p5 }
  0x4c   : > { %s4428_s16 = smov (%p69_p3, %s4426_s16), 0  ;;  %p2918_p12 = scmp.lt.s32.totalorder %s3547_s25, 4 }
  0x4d   : > { %4371 = sst [smem:[#allocation45_spill]] %s4428_s16  ;;  %s619_s5 = ssub.s32 %s3543_s3, %s4428_s16 }
  0x4e   : > { %s3821_s4 = scalar_select %p249_p4, %s3527_s29, %s251_s27  }
  0x4f   : > { %p620_p10 = scmp.eq.s32.totalorder %s619_s5, 0  ;;  %s3833_s24 = sand.u32 1, %s3527_s29  }
  0x50   : > { %4372 = sst [smem:[#allocation46_spill]] %s3821_s4  ;;  %s4318_s17 = sand.u32 1, %s3547_s25  }
  0x51   : > { %s3837_s22 = scalar_select %p620_p10, %s3515_s6, %s622_s23  }
  0x52   : > { %p3841_p13 = pnand %p2918_p12, %p3811_p2  ;;  %s861_s15 = scalar_lea.hbm %s4376_s11, %s3539_s30 }
  0x53   : > { %4374 = sst [smem:[#allocation47_spill]] %s3837_s22  ;;  %s863_s16 = sshll.u32 %s861_s15, 4  ;;  %s864_s16 = int_to_ptr.hbm [resolvable:$true] %s863_s16 }
  0x54   : > { %s858_s5 = scalar_lea.vmem [#allocation7], %s3833_s24  ;;  %s3852_s23 = scalar_lea.sflag [#allocation8], %s4318_s17 }
  0x55   : > { %s865_s3 = sshll.u32 %s858_s5, 4  ;;  %s4377_s18 = sld [smem:[#allocation66_spill]]  ;;  %s866_s3 = int_to_ptr.vmem [resolvable:$true] %s865_s3 }
  0x56   : > { %2898 = dma.hbm_to_vmem [thread:$0]  (!%p3841_p13), %s864_s16, 16, %s866_s3, %s3852_s23  }
  0x57   : > { %s3554_s19 = smov [#allocation15]   ;;  %s4378_s20 = sld [smem:[#allocation68_spill]] }
  0x58   : > { %s718_s15 = sshll.u32 %s3554_s19, 4  ;;  %s4379_s17 = smov 4   ;;  %s719_s15 = int_to_ptr.vmem [resolvable:$true] %s718_s15 }
  0x59   : > { %s4380_s22 = smov 64   ;;  %s3555_s3 = smov [#allocation18]  }
  0x5a   : > { %s747_s16 = sshll.u32 %s3555_s3, 4  ;;  %s4381_s21 = sld [smem:[#allocation69_spill]]  ;;  %s748_s16 = int_to_ptr.vmem [resolvable:$true] %s747_s16 }
  0x5b   : > { %s716_s29 = sshll.u32 %s4377_s18, 4  ;;  %s3556_s27 = smov [#allocation19]   ;;  %s717_s29 = int_to_ptr.hbm [resolvable:$true] %s716_s29 }
  0x5c   : > { %2882 = dma.hbm_to_vmem [thread:$0]  (!%p3781_p11), %s717_s29, 512, %s719_s15, [#allocation14], %s4380_s22, %s4380_s22, %s4379_s17  }
  0x5d   : > { %s745_s11 = sshll.u32 %s4378_s20, 4  ;;  %s759_s5 = sshll.u32 %s3556_s27, 4  ;;  %s746_s11 = int_to_ptr.hbm [resolvable:$true] %s745_s11  ;;  %s760_s5 = int_to_ptr.vmem [resolvable:$true] %s759_s5 }
  0x5e   : > { %2888 = dma.hbm_to_vmem [thread:$0]  (!%p3781_p11), %s746_s11, 16, %s748_s16, [#allocation17]  }
  0x5f   : > { %s4382_s17 = sld [smem:[#allocation55_spill]]  ;;  %s818_s3 = scalar_lea.vmem [#allocation4], %s3833_s24 }
  0x60   : > { %s757_s19 = sshll.u32 %s4381_s21, 4  ;;  %s825_s4 = sshll.u32 %s818_s3, 4  ;;  %s758_s19 = int_to_ptr.hbm [resolvable:$true] %s757_s19  ;;  %s826_s4 = int_to_ptr.vmem [resolvable:$true] %s825_s4 }
  0x61   : > { %2891 = dma.hbm_to_vmem [thread:$0]  (!%p3781_p11), %s758_s19, 16, %s760_s5, [#allocation20]  }
  0x62   : > { %s816_s11 = scalar_lea.sflag [#allocation5], %s3833_s24  ;;  %s4383_s12 = sld [smem:[#allocation60_spill]] }
  0x63   : > { %s875_s29 = scalar_lea.vmem [#allocation9], %s3833_s24  ;;  %s4384_s13 = sld [smem:[#allocation61_spill]] }
  0x64   : > { %s882_s1 = sshll.u32 %s875_s29, 4  ;;  %s892_s3 = scalar_lea.vmem [#allocation10], %s3833_s24  ;;  %s883_s1 = int_to_ptr.vmem [resolvable:$true] %s882_s1 }
  0x65   : > { %s821_s22 = scalar_lea.hbm %s4382_s17, %s3539_s30  ;;  %s899_s20 = sshll.u32 %s892_s3, 4  ;;  %s900_s20 = int_to_ptr.vmem [resolvable:$true] %s899_s20 }
  0x66   : > { %s823_s15 = sshll.u32 %s821_s22, 4  ;;  %s824_s15 = int_to_ptr.hbm [resolvable:$true] %s823_s15 }
  0x67   : > { %2895 = dma.hbm_to_vmem [thread:$0]  (!%p3841_p13), %s824_s15, 16, %s826_s4, %s816_s11  }
  0x68   : > { %s878_s18 = scalar_lea.hbm %s4383_s12, %s3539_s30  ;;  %s4385_s15 = sand.u32 1, %s3547_s25  }
  0x69   : > { %s880_s27 = sshll.u32 %s878_s18, 4  ;;  %s895_s17 = scalar_lea.hbm %s4384_s13, %s3539_s30  ;;  %s881_s27 = int_to_ptr.hbm [resolvable:$true] %s880_s27 }
  0x6a   : > { %2901 = dma.hbm_to_vmem [thread:$0]  (!%p3841_p13), %s881_s27, 16, %s883_s1, %s3852_s23  }
  0x6b   : > { %s897_s22 = sshll.u32 %s895_s17, 4  ;;  %s890_s4 = scalar_lea.sflag [#allocation11], %s4385_s15  ;;  %s898_s22 = int_to_ptr.hbm [resolvable:$true] %s897_s22 }
  0x6c   : > { %2904 = dma.hbm_to_vmem [thread:$0]  (!%p3841_p13), %s898_s22, 16, %s900_s20, %s890_s4  }
  0x6d   : > { %908 = sbr.rel (%p3770_p9) target bundleno = 3203 (0xc83), region = 112  ;;  %s3903_s11 = sand.u32 (!%p3770_p9), 1, %s3523_s2  }
  0x6e   : > { %s911_s23 = scalar_lea.sflag (!%p3770_p9), [#allocation5], %s3903_s11 }
  0x72   : > { %3470 = dma.done.wait (%p3825_p7), %s911_s23, 16  }
  0x73   : > { %3472 = vsyncadd (%p3825_p7), %s911_s23, 4294967280  ;;  %s919_s9 = sand.u32 1, %s3751_s8  }
  0x74   : > { %s920_s20 = scalar_lea.sflag [#allocation8], %s919_s9 }
  0x75   : > { %3474 = dma.done.wait (%p3825_p7), %s920_s20, 32  }
  0x76   : > { %3476 = vsyncadd (%p3825_p7), %s920_s20, 4294967264  ;;  %s938_s10 = scalar_lea.sflag [#allocation11], %s919_s9 }
  0x77   : > { %3478 = dma.done.wait (%p3825_p7), %s938_s10, 16  }
  0x78   : > { %3480 = vsyncadd (%p3825_p7), %s938_s10, 4294967280 }
  0x79   : > { %3482 = dma.done.wait (%p265_p0), [#allocation11], 16  }
  0x7a   : > { %3484 = vsyncadd (%p265_p0), [#allocation11], 4294967280 }
  0x7b   : > { %3486 = dma.done.wait (%p265_p0), [#allocation14], 528  }
  0x7c   : > { %3488 = vsyncadd (%p265_p0), [#allocation14], 4294966768 }
  0x7d   : > { %3490 = dma.done.wait (%p265_p0), [#allocation17], 528  }
  0x7e   : > { %3492 = vsyncadd (%p265_p0), [#allocation17], 4294966768 }
  0x7f   : > { %3494 = dma.done.wait (%p265_p0), [#allocation20], 16  }
  0x80   : > { %3496 = vsyncadd (%p265_p0), [#allocation20], 4294967280  ;;  %s3940_s14 = sand.u32 1, %s3511_s28   ;;  %p1089_p9 = scmp.lt.s32.totalorder %s3535_s7, 1 }
  0x81   : > { %s2518_s27 = sshll.u32 %s3940_s14, 3  ;;  %p1093_p11 = scmp.lt.s32.totalorder %s3531_s0, 1 }
  0x82   : > { %s1090_s29 = scalar_select %p1089_p9, %s3535_s7, 1 }
  0x83   : > { %s3947_s1 = scalar_select %p1093_p11, %s3531_s0, 1 }
  0x84   : > { %s2519_s8 = sshll.u32 %s1090_s29, 3  ;;  %s4386_s17 = sld [smem:[#allocation48_spill]] }
  0x85   : > { %s2777_s3 = sshll.u32 %s3947_s1, 6  ;;  %s4387_s23 = sld [smem:[#allocation50_spill]] }
  0x86   : > { %s2522_s20 = sshll.u32 %s3947_s1, 1  ;;  %s4388_s24 = sld [smem:[#allocation51_spill]] }
  0x87   : > { %s2778_s16 = sshll.u32 %s3947_s1, 5  ;;  %s4389_s29 = sld [smem:[#allocation52_spill]] }
  0x88   : > { %s4390_s5 = sld [smem:[#allocation53_spill]]  ;;  %s2780_s12 = sshll.u32 %s3947_s1, 7 }
  0x89   : > { %s4391_s4 = sld [smem:[#allocation54_spill]]  ;;  %s1088_s30 = scalar_lea.vmem [#allocation22], %s3940_s14 }
  0x8a   : > { %s1092_s22 = scalar_lea.vmem %s4386_s17, %s2519_s8  ;;  %s4392_s28 = sld [smem:[#allocation56_spill]] }
  0x8b   : > { %s3956_s9 = scalar_lea.vmem %s4387_s23, %s2777_s3  ;;  %s4393_s25 = sld [smem:[#allocation57_spill]] }
  0x8c   : > { %s3962_s26 = scalar_lea.vmem %s4388_s24, %s2522_s20  ;;  %s3994_s8 = scalar_lea.vmem [#allocation21], %s2518_s27 }
  0x8d   : > { %s3968_s21 = scalar_lea.vmem %s4389_s29, %s2778_s16  ;;  %s4394_s29 = sld [smem:[#allocation58_spill]] }
  0x8e   : > { %s1109_s17 = scalar_lea.vmem %s4390_s5, %s3947_s1  ;;  %p2530_p0 = scmp.ne.s32.totalorder %s3531_s0, 0 }
  0x8f   : > { %s1112_s23 = scalar_lea.vmem %s4391_s4, %s3947_s1  ;;  %s4395_s2 = sld [smem:[#allocation49_spill]] (!%p2530_p0) }
  0x90   : > { %s3981_s18 = scalar_lea.vmem %s4392_s28, %s2777_s3  ;;  %1131 = sbr.rel (%p2530_p0) target bundleno = 156 (0x9c), region = 156 }
  0x91   : > { %s3986_s7 = scalar_lea.vmem %s4393_s25, %s2522_s20 }
  0x93   : > { %s3992_s19 = scalar_lea.vmem %s4394_s29, %s2780_s12 }
  0x95   : > { %v1132_v1 = vld [vmem:[%s1092_s22] sm:$0xff]  ;;  %vm1136_vm0 = vcmask 519168  }
  0x96   : > { %v1133_v2 = vld [vmem:[%s4395_s2] sm:$0xff] }
  0x97   : > { %v1134_v3 = vadd.f32 %v1133_v2, %v1132_v1 }
  0x99   : > { %v1135_v4 = vpack.c.bf16 %v1134_v3, %v1134_v3 }
  0x9b   : > { %1137 = vst.msk [vmem:[#allocation2] sm:$0xf] %vm1136_vm0, %v1135_v4 }
  0x9c PF: > { %v2557_v5 = vld [vmem:[%s3956_s9 + $0x30] sm:$0xf]  ;;  %v2788_v6 = vld [vmem:[%s3956_s9 + $0x34] sm:$0xf0]  ;;  %v2549_v7 = vld [vmem:[%s3956_s9 + $0x20] sm:$0xf]  ;;  %v1225_v46 = vlaneseq }
  0x9d   : > { %v2558_v8 = vor.u32 %v2788_v6, %v2557_v5  ;;  %v2786_v9 = vld [vmem:[%s3956_s9 + $0x24] sm:$0xf0]  ;;  %v2541_v11 = vld [vmem:[%s3956_s9 + $0x10] sm:$0xf]  ;;  %v2784_v12 = vld [vmem:[%s3956_s9 + $0x14] sm:$0xf0] }
  0x9e   : > { %v2550_v10 = vor.u32 %v2786_v9, %v2549_v7  ;;  %v2542_v13 = vor.u32 %v2784_v12, %v2541_v11  ;;  %v2533_v14 = vld [vmem:[%s3956_s9] sm:$0xf]  ;;  %v2782_v15 = vld [vmem:[%s3956_s9 + $0x4] sm:$0xf0]  ;;  %v2787_v16 = vld [vmem:[%s3956_s9 + $0x34] sm:$0xf] }
  0x9f   : > { %1202 = vmatpush.bf16.msra.mxu1 %v2558_v8  ;;  %v2559_v17 = vld [vmem:[%s3956_s9 + $0x38] sm:$0xf0]  ;;  %v2534_v18 = vor.u32 %v2782_v15, %v2533_v14  ;;  %v2785_v20 = vld [vmem:[%s3956_s9 + $0x24] sm:$0xf]  ;;  %v2551_v21 = vld [vmem:[%s3956_s9 + $0x28] sm:$0xf0] }
  0xa0   : > { %v2562_v19 = vor.u32 %v2787_v16, %v2559_v17  ;;  %vm1194_vm1 = vcmask 523264   ;;  %v2554_v23 = vor.u32 %v2785_v20, %v2551_v21  ;;  %v2783_v24 = vld [vmem:[%s3956_s9 + $0x14] sm:$0xf]  ;;  %v2543_v25 = vld [vmem:[%s3956_s9 + $0x18] sm:$0xf0]  ;;  %vm1273_vm2 = vcmask 1043456  }
  0xa1   : > { %v2546_v26 = vor.u32 %v2783_v24, %v2543_v25  ;;  %v2781_v27 = vld [vmem:[%s3956_s9 + $0x4] sm:$0xf]  ;;  %v2535_v28 = vld [vmem:[%s3956_s9 + $0x8] sm:$0xf0]  ;;  %v1148_v32 = vld [vmem:[%s3962_s26] sm:$0x3] }
  0xa2   : > { %v4013_v22 = vld [vmem:[#allocation2] sm:$0xf]  ;;  %v2538_v29 = vor.u32 %v2781_v27, %v2535_v28  ;;  %v1150_v33 = vperm.slane %v1148_v32, 0  ;;  %v1151_v34 = vperm.slane %v1148_v32, 1  ;;  %s3557_s25 = smov 112   ;;  %s3558_s26 = smov 64  }
  0xa3   : > { %1203 = vmatpush.bf16.msra.mxu1 %v2550_v10  ;;  %vm1236_vm3 = vcmask 130048   ;;  %v1226_v47 = vshrl.u32 %v1225_v46, 7  ;;  %v4037_v48 = vand.u32 127, %v1225_v46  ;;  %v3559_v49 = vmov 0.0   ;;  %s3560_s27 = smov 16   ;;  %s3561_s22 = smov 80  }
  0xa4   : > { %vm1256_vm5 = vcmask 64512   ;;  %s3562_s3 = smov 48   ;;  %s3563_s9 = smov 32   ;;  %vm1474_vm6 = vcmask 261120   ;;  %vm1476_vm7 = vcmask 392192   ;;  %vm1857_vm15 = vcmask 519168  }
  0xa5   : > { %vm1229_vm4 = vcmp.gt.s32.totalorder %v4037_v48, %v1226_v47  ;;  %s3564_s20 = smov 96   ;;  %s4398_s24 = scalar_lea.vmem [#allocation4], %s3903_s11 }
  0xa6   : > { %v4040_v50 = vsel %vm1229_vm4, -1e+30, %v3559_v49  ;;  %s4400_s1 = scalar_lea.vmem [#allocation9], %s3903_s11  ;;  %p2688_p1 = scmp.ne.s32.totalorder %s3531_s0, 1 }
  0xa7   : > { %1204 = vmatpush.bf16.msra.mxu1 %v2542_v13  ;;  %s4402_s12 = sld [smem:[#allocation62_spill]] (!%p2688_p1) }
  0xa8   : > { %s4403_s29 = sld [smem:[#allocation64_spill]] (!%p2688_p1) }
  0xab   : > { %1205 = vmatpush.bf16.msra.mxu1 %v2534_v18 }
  0xae   : > { %2563 = vmatmul.msk.bf16.vlgmr.msra.gmra.mxu1 %vm1194_vm1, %v4013_v22 }
  0xaf   : > { %1215 = vmatpush.bf16.msrb.mxu1 %v2562_v19 }
  0xb3   : > { %1216 = vmatpush.bf16.msrb.mxu1 %v2554_v23 }
  0xb7   : > { %1217 = vmatpush.bf16.msrb.mxu1 %v2546_v26 }
  0xbb   : > { %1218 = vmatpush.bf16.msrb.mxu1 %v2538_v29 }
  0xbe   : > { %2564 = vmatmul.msk.bf16.vlgmr.msrb.gmra.mxu1 %vm1194_vm1, %v4013_v22 }
 0x12b   : > { %v1207_v30 = vpop.f32.mrf.mxu1 }
 0x12c   : > { %v1208_v36 = vadd.f32 %v1207_v30, %v1150_v33 }
 0x133   : > { %v1209_v31 = vpop.f32.mrf.mxu1 }
 0x13b   : > { %v1220_v35 = vpop.f32.mrf.mxu1 }
 0x13c   : > { %v1221_v37 = vadd.f32 %v1220_v35, %v1151_v34 }
 0x13e   : > { %v4024_v38 = vpack.c.bf16 %v1221_v37, %v1208_v36 }
 0x140   : > { %v1232_v39 = vunpack.c.l.b16 %v4024_v38  ;;  %v1269_v40 = vrot.slane %v4024_v38, 4 }
 0x142   : > { %v4028_v41 = vpack.c.b16 %v1232_v39, %v1232_v39  ;;  %v1275_v42 = vsel %vm1273_vm2, %v1269_v40, 0 }
 0x143   : > { %v1222_v43 = vpop.f32.mrf.mxu1  ;;  %1284 = vmatpush.bf16.msra.mxu3 %v1275_v42 }
 0x144   : > { %1290 = vrot.lane.b32.xlu2 %v4028_v41, %s3557_s25  ;;  %1234 = vrot.lane.b32.xlu0 %v4028_v41, %s3558_s26 }
 0x19e   : > { %v1291_v2 = vpop.permute.xlu2 %1290 }
 0x1b6   : > { %v1235_v44 = vpop.permute.xlu0 %1234 }
 0x1b7   : > { %v1241_v45 = vsel %vm1236_vm3, %v1235_v44, 0 }
 0x1b8   : > { %1250 = vmatpush.bf16.xpose.msra.mxu2 %v1241_v45 }
 0x1bf   : > { %2565 = vmatmul.msk.bf16.vlgmr.msra.gmra.mxu2 %vm1236_vm3, %v4024_v38 }
 0x242   : > { %v1252_v51 = vpop.f32.mrf.mxu2 }
 0x243   : > { %v1253_v52 = vadd.f32 %v1252_v51, %v4040_v50 }
 0x245   : > { %v1257_v53 = vsel %vm1256_vm5, %v1253_v52, -inf }
 0x246   : > { %1258 = vmax.xlane.f32.xlu0 %v1257_v53 }
 0x24a   : > { %v1254_v54 = vpop.f32.mrf.mxu2 }
 0x25a   : > { %1406 = vrot.lane.b32.xlu0 %v4028_v41, %s3560_s27 }
 0x262   : > { %1404 = vrot.lane.b32.xlu0 %v4028_v41, %s3561_s22 }
 0x2b9   : > { %v1259_v55 = vpop.xlane.xlu0 %1258 }
 0x2ba   : > { %v1260_v56 = vsub.f32 %v1253_v52, %v1259_v55 }
 0x2bc   : > { %v1261_v57 = vmul.f32 1.442695, %v1260_v56 }
 0x2be   : > { %3038 = vpow2.f32 %v1261_v57 }
 0x2c4   : > { %v3039_v58 = vpop.eup %3038 }
 0x2c5   : > { %v1263_v59 = vsel %vm1256_vm5, %v3039_v58, 0.0 }
 0x2c6   : > { %1264 = vadd.xlane.f32.xlu1 %v1263_v59 }
 0x2cc   : > { %v1407_v13 = vpop.permute.xlu0 %1406 }
 0x2cd   : > { %v1412_v17 = vsel %vm1236_vm3, %v1407_v13, 0 }
 0x2d4   : > { %v1405_v27 = vpop.permute.xlu0 %1404 }
 0x2df   : > { %1292 = vrot.lane.b32.xlu1 %v4028_v41, %s3562_s3 }
 0x339   : > { %v1265_v60 = vpop.xlane.xlu1 %1264 }
 0x33a   : > { %3040 = vrcp.f32 %v1265_v60 }
 0x340   : > { %v3041_v61 = vpop.eup %3040 }
 0x341   : > { %v1267_v62 = vmul.f32 %v3041_v61, %v3039_v58 }
 0x343   : > { %v1268_v63 = vpack.c.bf16 %v1267_v62, %v1267_v62 }
 0x345   : > { %2566 = vmatmul.msk.bf16.vlgmr.msra.gmra.mxu3 %vm1256_vm5, %v1268_v63 }
 0x351   : > { %v1293_v0 = vpop.permute.xlu1 %1292 }
 0x352   : > { %v1298_v1 = vsel %vm1236_vm3, %v1293_v0, 0 }
 0x353   : > { %1307 = vmatpush.bf16.xpose.msrb.mxu3 %v1298_v1 }
 0x35a   : > { %2567 = vmatmul.msk.bf16.vlgmr.msrb.gmra.mxu3 %vm1236_vm3, %v1291_v2 }
 0x3c8   : > { %v4054_v3 = vpop.f32.mrf.mxu3 }
 0x3d0   : > { %v1288_v4 = vpop.f32.mrf.mxu3 }
 0x3d1   : > { %v2792_v4 = vld [vmem:[%s3968_s21 + $0x18] sm:$0xff] }
 0x3dd   : > { %v1309_v5 = vpop.f32.mrf.mxu3 }
 0x3de   : > { %v1310_v6 = vadd.f32 %v1309_v5, %v4040_v50  ;;  %v2791_v5 = vld [vmem:[%s3968_s21 + $0x10] sm:$0xff] }
 0x3e0   : > { %v1313_v7 = vsel %vm1256_vm5, %v1310_v6, -inf }
 0x3e1   : > { %1314 = vmax.xlane.f32.xlu2 %v1313_v7  ;;  %v2789_v7 = vld [vmem:[%s3968_s21] sm:$0xff] }
 0x3e5   : > { %v1311_v8 = vpop.f32.mrf.mxu3 }
 0x3f9   : > { %1325 = vrot.lane.b32.xlu2 %v4024_v38, %s3557_s25 }
 0x401   : > { %1349 = vrot.lane.b32.xlu2 %v4028_v41, %s3563_s9 }
 0x454   : > { %v1315_v9 = vpop.xlane.xlu2 %1314 }
 0x455   : > { %v1316_v10 = vsub.f32 %v1310_v6, %v1315_v9  ;;  %v2790_v6 = vld [vmem:[%s3968_s21 + $0x8] sm:$0xff] }
 0x457   : > { %v1317_v11 = vmul.f32 1.442695, %v1316_v10 }
 0x459   : > { %3042 = vpow2.f32 %v1317_v11 }
 0x45c   : > { %v1326_v12 = vpop.permute.xlu2 %1325 }
 0x45d   : > { %v1327_v14 = vrot.slane %v1326_v12, 4 }
 0x45f   : > { %v3043_v15 = vpop.eup %3042  ;;  %v1332_v16 = vsel %vm1273_vm2, %v1327_v14, 0 }
 0x460   : > { %1341 = vmatpush.bf16.msra.mxu3 %v1332_v16  ;;  %v1319_v18 = vsel %vm1256_vm5, %v3043_v15, 0.0  ;;  %v1139_v16 = vunpack.c.l.bf16 %v4013_v22 }
 0x461   : > { %1320 = vadd.xlane.f32.xlu1 %v1319_v18 }
 0x464   : > { %1421 = vmatpush.bf16.xpose.msrb.mxu3 %v1412_v17  ;;  %v1350_v19 = vpop.permute.xlu2 %1349 }
 0x465   : > { %v1355_v20 = vsel %vm1236_vm3, %v1350_v19, 0 }
 0x466   : > { %1364 = vmatpush.bf16.xpose.msra.mxu0 %v1355_v20 }
 0x46e   : > { %1522 = vmatpush.bf16.msrb.mxu0 %v2792_v4  ;;  %v2805_v4 = vld [vmem:[%s3992_s19 + $0x20] sm:$0xff] }
 0x472   : > { %1523 = vmatpush.bf16.msrb.mxu0 %v2791_v5  ;;  %v2813_v5 = vld [vmem:[%s3992_s19 + $0x60] sm:$0xff] }
 0x476   : > { %1524 = vmatpush.bf16.msrb.mxu0 %v2790_v6 }
 0x47a   : > { %1347 = vrot.lane.b32.xlu1 %v4028_v41, %s3564_s20  ;;  %1525 = vmatpush.bf16.msrb.mxu0 %v2789_v7 }
 0x4d4   : > { %v1321_v21 = vpop.xlane.xlu1 %1320 }
 0x4d5   : > { %3044 = vrcp.f32 %v1321_v21  ;;  %v3565_v21 = vmov 64.0  }
 0x4db   : > { %v3045_v23 = vpop.eup %3044 }
 0x4dc   : > { %v1323_v24 = vmul.f32 %v3045_v23, %v3043_v15  ;;  %v3032_v15 = vld [vmem:[%s1109_s17] ss:$0 sm:$0xff] }
 0x4de   : > { %v1324_v25 = vpack.c.bf16 %v1323_v24, %v1323_v24 }
 0x4e0   : > { %2568 = vmatmul.msk.bf16.vlgmr.msra.gmra.mxu3 %vm1256_vm5, %v1324_v25 }
 0x4ec   : > { %v1348_v26 = vpop.permute.xlu1 %1347 }
 0x4ed   : > { %2569 = vmatmul.msk.bf16.vlgmr.msra.gmra.mxu0 %vm1236_vm3, %v1348_v26 }
 0x4f0   : > { %2571 = vmatmul.msk.bf16.vlgmr.msrb.gmra.mxu3 %vm1236_vm3, %v1405_v27 }
 0x563   : > { %v1343_v28 = vpop.f32.mrf.mxu3 }
 0x56a   : > { %v1366_v29 = vpop.f32.mrf.mxu0 }
 0x56b   : > { %v1367_v30 = vadd.f32 %v1366_v29, %v4040_v50  ;;  %v1345_v31 = vpop.f32.mrf.mxu3 }
 0x56d   : > { %v1370_v32 = vsel %vm1256_vm5, %v1367_v30, -inf }
 0x56e   : > { %1371 = vmax.xlane.f32.xlu2 %v1370_v32 }
 0x572   : > { %v1368_v33 = vpop.f32.mrf.mxu0 }
 0x573   : > { %v1423_v34 = vpop.f32.mrf.mxu3  ;;  %v2616_v33 = vld [vmem:[%s3981_s18 + $0x30] sm:$0xf] }
 0x574   : > { %v1424_v35 = vadd.f32 %v1423_v34, %v4040_v50  ;;  %v2800_v34 = vld [vmem:[%s3981_s18 + $0x34] sm:$0xf0] }
 0x576   : > { %v1427_v36 = vsel %vm1256_vm5, %v1424_v35, -inf }
 0x577   : > { %1428 = vmax.xlane.f32.xlu0 %v1427_v36  ;;  %v2617_v36 = vor.u32 %v2800_v34, %v2616_v33 }
 0x57b   : > { %v1425_v37 = vpop.f32.mrf.mxu3 }
 0x57c   : > { %v2618_v37 = vld [vmem:[%s3981_s18 + $0x38] sm:$0xf0] }
 0x586   : > { %1439 = vrot.lane.b32.xlu2 %v4024_v38, %s3561_s22 }
 0x5e1   : > { %v1372_v39 = vpop.xlane.xlu2 %1371 }
 0x5e2   : > { %v1373_v40 = vsub.f32 %v1367_v30, %v1372_v39 }
 0x5e4   : > { %v1374_v41 = vmul.f32 1.442695, %v1373_v40  ;;  %v2608_v40 = vld [vmem:[%s3981_s18 + $0x20] sm:$0xf] }
 0x5e6   : > { %3046 = vpow2.f32 %v1374_v41  ;;  %v2798_v41 = vld [vmem:[%s3981_s18 + $0x24] sm:$0xf0] }
 0x5e9   : > { %v1440_v42 = vpop.permute.xlu2 %1439 }
 0x5ea   : > { %v1441_v43 = vrot.slane %v1440_v42, 4  ;;  %v1429_v44 = vpop.xlane.xlu0 %1428  ;;  %v2797_v42 = vld [vmem:[%s3981_s18 + $0x24] sm:$0xf] }
 0x5eb   : > { %v1430_v45 = vsub.f32 %v1424_v35, %v1429_v44  ;;  %v2799_v35 = vld [vmem:[%s3981_s18 + $0x34] sm:$0xf]  ;;  %v2610_v44 = vld [vmem:[%s3981_s18 + $0x28] sm:$0xf0] }
 0x5ec   : > { %v3047_v46 = vpop.eup %3046  ;;  %v1446_v47 = vsel %vm1273_vm2, %v1441_v43, 0  ;;  %v2621_v39 = vor.u32 %v2799_v35, %v2618_v37  ;;  %v2609_v43 = vor.u32 %v2798_v41, %v2608_v40 }
 0x5ed   : > { %v1431_v49 = vmul.f32 1.442695, %v1430_v45  ;;  %1455 = vmatpush.bf16.msrb.mxu2 %v1446_v47  ;;  %v1376_v50 = vsel %vm1256_vm5, %v3047_v46, 0.0  ;;  %v2613_v45 = vor.u32 %v2797_v42, %v2610_v44  ;;  %v2796_v47 = vld [vmem:[%s3981_s18 + $0x14] sm:$0xf0] }
 0x5ee   : > { %1377 = vadd.xlane.f32.xlu0 %v1376_v50  ;;  %1646 = vmatpush.bf16.msra.mxu3 %v2621_v39 }
 0x5ef   : > { %3048 = vpow2.f32 %v1431_v49  ;;  %v2795_v49 = vld [vmem:[%s3981_s18 + $0x14] sm:$0xf] }
 0x5f2   : > { %1647 = vmatpush.bf16.msra.mxu3 %v2613_v45 }
 0x5f5   : > { %v3049_v51 = vpop.eup %3048 }
 0x5f6   : > { %v1433_v52 = vsel %vm1256_vm5, %v3049_v51, 0.0 }
 0x5f7   : > { %1434 = vadd.xlane.f32.xlu1 %v1433_v52 }
 0x602   : > { %1382 = vrot.lane.b32.xlu0 %v4024_v38, %s3564_s20 }
 0x610   : > { %1462 = vrot.lane.b32.xlu1 %v1343_v28, %s3560_s27 }
 0x661   : > { %v1378_v53 = vpop.xlane.xlu0 %1377 }
 0x66a   : > { %v1435_v54 = vpop.xlane.xlu1 %1434 }
 0x66b   : > { %3050 = vrcp.f32 %v1435_v54  ;;  %v2794_v54 = vld [vmem:[%s3981_s18 + $0x4] sm:$0xf0] }
 0x66c   : > { %3052 = vrcp.f32 %v1378_v53  ;;  %v2592_v53 = vld [vmem:[%s3981_s18] sm:$0xf] }
 0x66d   : > { %3054 = vrcp.f32 %v3565_v21  ;;  %v2811_v21 = vld [vmem:[%s3992_s19 + $0x50] sm:$0xff] }
 0x671   : > { %v3051_v55 = vpop.eup %3050 }
 0x672   : > { %v3053_v56 = vpop.eup %3052  ;;  %v1437_v57 = vmul.f32 %v3051_v55, %v3049_v51  ;;  %v2602_v51 = vld [vmem:[%s3981_s18 + $0x18] sm:$0xf0]  ;;  %v2793_v55 = vld [vmem:[%s3981_s18 + $0x4] sm:$0xf] }
 0x673   : > { %v1380_v60 = vmul.f32 %v3053_v56, %v3047_v46  ;;  %v3055_v23 = vpop.eup %3054  ;;  %v2600_v46 = vld [vmem:[%s3981_s18 + $0x10] sm:$0xf]  ;;  %v2605_v52 = vor.u32 %v2795_v49, %v2602_v51  ;;  %v2593_v56 = vor.u32 %v2794_v54, %v2592_v53 }
 0x674   : > { %v1383_v58 = vpop.permute.xlu0 %1382  ;;  %v1438_v59 = vpack.c.bf16 %v1437_v57, %v1437_v57  ;;  %v1538_v24 = vmul.f32 64.0, %v3055_v23  ;;  %vm1542_vm8 = vweird.f32 %v3055_v23  ;;  %v2601_v50 = vor.u32 %v2796_v47, %v2600_v46  ;;  %v2594_v57 = vld [vmem:[%s3981_s18 + $0x8] sm:$0xf0] }
 0x675   : > { %v1384_v61 = vrot.slane %v1383_v58, 4  ;;  %v1381_v62 = vpack.c.bf16 %v1380_v60, %v1380_v60  ;;  %1648 = vmatpush.bf16.msra.mxu3 %v2605_v52  ;;  %v2597_v58 = vor.u32 %v2793_v55, %v2594_v57  ;;  %v2816_v60 = vld [vmem:[%s3992_s19 + $0x78] sm:$0xff] }
 0x676   : > { %2572 = vmatmul.msk.bf16.vlgmr.msrb.gmra.mxu2 %vm1256_vm5, %v1438_v59  ;;  %v1539_v25 = vsub.f32 1.0, %v1538_v24  ;;  %v2808_v59 = vld [vmem:[%s3992_s19 + $0x38] sm:$0xff]  ;;  %1810 = vmatpush.bf16.msra.mxu0 %v2816_v60  ;;  %v2810_v24 = vld [vmem:[%s3992_s19 + $0x48] sm:$0xff] }
 0x677   : > { %v1389_v38 = vsel %vm1273_vm2, %v1384_v61, 0  ;;  %1797 = vmatpush.bf16.msra.mxu2 %v2808_v59 }
 0x678   : > { %1398 = vmatpush.bf16.msra.mxu1 %v1389_v38  ;;  %v1540_v26 = vmul.f32 %v3055_v23, %v1539_v25  ;;  %v2801_v25 = vld [vmem:[%s3992_s19] sm:$0xff] }
 0x679   : > { %1649 = vmatpush.bf16.msra.mxu3 %v2597_v58 }
 0x67a   : > { %v1541_v27 = vadd.f32 %v3055_v23, %v1540_v26  ;;  %v2809_v26 = vld [vmem:[%s3992_s19 + $0x40] sm:$0xff] }
 0x67b   : > { %2570 = vmatmul.msk.bf16.vlgmr.msra.gmra.mxu1 %vm1256_vm5, %v1381_v62  ;;  %v2807_v62 = vld [vmem:[%s3992_s19 + $0x30] sm:$0xff] }
 0x67c   : > { %v4102_v22 = vsel %vm1542_vm8, %v3055_v23, %v1541_v27  ;;  %1633 = vmatpush.bf16.msrb.mxu1 %v2617_v36  ;;  %1798 = vmatpush.bf16.msra.mxu2 %v2807_v62  ;;  %v2802_v23 = vld [vmem:[%s3992_s19 + $0x8] sm:$0xff]  ;;  %v1580_v27 = vld [vmem:[%s3986_s7] sm:$0x3]  ;;  %s4399_s7 = scalar_lea.vmem [#allocation7], %s3903_s11 }
 0x67d   : > { %v3035_v45 = vld [vmem:[%s4399_s7] ss:$0 sm:$0xff] }
 0x680   : > { %1634 = vmatpush.bf16.msrb.mxu1 %v2609_v43 }
 0x682   : > { %v1463_v8 = vpop.permute.xlu1 %1462 }
 0x683   : > { %v1473_v10 = vsel %vm1236_vm3, %v4054_v3, %v1463_v8 }
 0x684   : > { %1635 = vmatpush.bf16.msrb.mxu1 %v2601_v50 }
 0x688   : > { %1636 = vmatpush.bf16.msrb.mxu1 %v2593_v56 }
 0x6f8   : > { %v1400_v63 = vpop.f32.mrf.mxu1 }
 0x6f9   : > { %v1457_v0 = vpop.f32.mrf.mxu2  ;;  %1466 = vrot.lane.b32.xlu2 %v1400_v63, %s3563_s9  ;;  %v2815_v63 = vld [vmem:[%s3992_s19 + $0x70] sm:$0xff] }
 0x6fa   : > { %1470 = vrot.lane.b32.xlu0 %v1457_v0, %s3562_s3  ;;  %1811 = vmatpush.bf16.msra.mxu0 %v2815_v63 }
 0x700   : > { %v1402_v1 = vpop.f32.mrf.mxu1 }
 0x701   : > { %v1459_v2 = vpop.f32.mrf.mxu2  ;;  %v2806_v1 = vld [vmem:[%s3992_s19 + $0x28] sm:$0xff] }
 0x702   : > { %v2814_v2 = vld [vmem:[%s3992_s19 + $0x68] sm:$0xff]  ;;  %1799 = vmatpush.bf16.msra.mxu2 %v2806_v1 }
 0x703   : > { %1812 = vmatpush.bf16.msra.mxu0 %v2814_v2 }
 0x706   : > { %1800 = vmatpush.bf16.msra.mxu2 %v2805_v4  ;;  %v3036_v4 = vld [vmem:[%s4400_s1] ss:$0 sm:$0xff] }
 0x707   : > { %1813 = vmatpush.bf16.msra.mxu0 %v2813_v5 }
 0x753   : > { %v1467_v9 = vpop.permute.xlu2 %1466 }
 0x754   : > { %v1475_v11 = vsel %vm1474_vm6, %v1473_v10, %v1467_v9 }
 0x76c   : > { %v1471_v12 = vpop.permute.xlu0 %1470 }
 0x76d   : > { %v1477_v13 = vsel %vm1476_vm7, %v1475_v11, %v1471_v12  ;;  %v3033_v12 = vld [vmem:[%s1112_s23] ss:$0 sm:$0xff]  ;;  %s4401_s23 = scalar_lea.vmem [#allocation10], %s3903_s11 }
 0x76e   : > { %v1478_v14 = vpack.c.bf16 %v1477_v13, %v1477_v13 }
 0x770   : > { %2589 = vmatmul.msk.bf16.vlgmr.msrb.gmra.mxu0 %vm1194_vm1, %v1478_v14  ;;  %v3034_v14 = vld [vmem:[%s4398_s24] ss:$0 sm:$0xff] }
 0x7ed   : > { %v1527_v17 = vpop.f32.mrf.mxu0 }
 0x7ee   : > { %v1528_v18 = vadd.f32 %v3032_v15, %v1527_v17 }
 0x7f0   : > { %v1531_v19 = vadd.f32 %v1528_v18, %v1139_v16 }
 0x7f2   : > { %v1534_v20 = vsel %vm1194_vm1, %v1531_v19, 0.0 }
 0x7f3   : > { %1535 = vadd.xlane.f32.xlu2 %v1534_v20  ;;  %v2812_v20 = vld [vmem:[%s3992_s19 + $0x58] sm:$0xff] }
 0x7f4   : > { %1814 = vmatpush.bf16.msra.mxu0 %v2812_v20 }
 0x7f5   : > { %v1529_v3 = vpop.f32.mrf.mxu0 }
 0x7f6   : > { %v2803_v3 = vld [vmem:[%s3992_s19 + $0x10] sm:$0xff] }
 0x7f8   : > { %1815 = vmatpush.bf16.msra.mxu0 %v2811_v21 }
 0x7fc   : > { %1816 = vmatpush.bf16.msra.mxu0 %v2810_v24 }
 0x800   : > { %1817 = vmatpush.bf16.msra.mxu0 %v2809_v26 }
 0x866   : > { %v1536_v28 = vpop.xlane.xlu2 %1535 }
 0x867   : > { %v1544_v29 = vmul.f32 %v4102_v22, %v1536_v28 }
 0x869   : > { %v4105_v30 = vsub.f32 %v1531_v19, %v1544_v29  ;;  %v2804_v19 = vld [vmem:[%s3992_s19 + $0x18] sm:$0xff]  ;;  %v1582_v29 = vperm.slane %v1580_v27, 0  ;;  %s4404_s19 = smov (!%p2688_p1), %s4403_s29 }
 0x86a   : > { %1801 = vmatpush.bf16.msra.mxu2 %v2804_v19 }
 0x86b   : > { %v1546_v31 = vmul.f32 %v4105_v30, %v4105_v30 }
 0x86d   : > { %v1547_v32 = vsel %vm1194_vm1, %v1546_v31, 0.0 }
 0x86e   : > { %1548 = vadd.xlane.f32.xlu0 %v1547_v32  ;;  %1802 = vmatpush.bf16.msra.mxu2 %v2803_v3 }
 0x872   : > { %1803 = vmatpush.bf16.msra.mxu2 %v2802_v23 }
 0x876   : > { %1804 = vmatpush.bf16.msra.mxu2 %v2801_v25 }
 0x8e1   : > { %v1549_v61 = vpop.xlane.xlu0 %1548 }
 0x8e2   : > { %v1550_v38 = vmul.f32 %v1549_v61, %v4102_v22 }
 0x8e4   : > { %v1551_v0 = vadd.f32 1e-05, %v1550_v38 }
 0x8e6   : > { %3056 = vrsqrt.f32 %v1551_v0  ;;  %vm1558_vm10 = vweird.f32 %v1551_v0 }
 0x8ec   : > { %v3057_v6 = vpop.eup %3056 }
 0x8ed   : > { %v1553_v7 = vmul.f32 %v3057_v6, %v1551_v0  ;;  %vm1559_vm9 = vweird.f32 %v3057_v6 }
 0x8ee   : > { %vm1560_vm11 = vmor %vm1558_vm10, %vm1559_vm9 }
 0x8ef   : > { %v1554_v8 = vmul.f32 %v3057_v6, %v1553_v7 }
 0x8f1   : > { %v1555_v9 = vmul.f32 0.5, %v1554_v8 }
 0x8f3   : > { %v1556_v10 = vsub.f32 1.5, %v1555_v9 }
 0x8f5   : > { %v1557_v11 = vmul.f32 %v3057_v6, %v1556_v10 }
 0x8f7   : > { %v1561_v13 = vsel %vm1560_vm11, %v3057_v6, %v1557_v11  ;;  %v3037_v6 = vld [vmem:[%s4401_s23] ss:$0 sm:$0xff] }
 0x8f8   : > { %v1562_v15 = vmul.f32 %v1561_v13, %v4105_v30  ;;  %v1583_v30 = vperm.slane %v1580_v27, 1 }
 0x8fa   : > { %v1566_v16 = vmul.f32 %v3033_v12, %v1562_v15 }
 0x8fc   : > { %v1570_v17 = vadd.f32 %v3034_v14, %v1566_v16 }
 0x8fe   : > { %v1571_v18 = vpack.c.bf16 %v1570_v17, %v1570_v17 }
 0x900   : > { %2622 = vmatmul.msk.bf16.vlgmr.msrb.gmra.mxu1 %vm1194_vm1, %v1571_v18  ;;  %2623 = vmatmul.msk.bf16.vlgmr.msra.gmra.mxu3 %vm1194_vm1, %v1571_v18 }
 0x97d   : > { %v1638_v28 = vpop.f32.mrf.mxu1 }
 0x97e   : > { %v1639_v31 = vadd.f32 %v1638_v28, %v1582_v29 }
 0x980   : > { %v1655_v35 = vmax.f32 %v1639_v31, 0.0 }
 0x983   : > { %v1651_v32 = vpop.f32.mrf.mxu3 }
 0x984   : > { %v1652_v33 = vadd.f32 %v1651_v32, %v1583_v30 }
 0x985   : > { %v1640_v34 = vpop.f32.mrf.mxu1 }
 0x986   : > { %v1656_v36 = vmax.f32 %v1652_v33, 0.0 }
 0x988   : > { %v1657_v37 = vpack.c.bf16 %v1656_v36, %v1655_v35 }
 0x98a   : > { %v1695_v39 = vunpack.c.l.b16 %v1657_v37  ;;  %v1696_v40 = vunpack.c.h.b16 %v1657_v37 }
 0x98b   : > { %v1653_v41 = vpop.f32.mrf.mxu3 }
 0x98c   : > { %v1697_v42 = vpack.c.b16 %v1695_v39, %v1695_v39  ;;  %v1698_v43 = vpack.c.b16 %v1696_v40, %v1696_v40 }
 0x98e   : > { %1805 = vmatmul.bf16.vlgmr.msra.gmra.mxu2 %v1697_v42  ;;  %1818 = vmatmul.bf16.vlgmr.msra.gmra.mxu0 %v1698_v43 }
 0xa0b   : > { %v1819_v44 = vpop.f32.mrf.mxu0 }
 0xa11   : > { %v1806_v46 = vpop.f32.mrf.mxu2 }
 0xa12   : > { %v1807_v47 = vadd.f32 %v3035_v45, %v1806_v46 }
 0xa13   : > { %v1821_v49 = vpop.f32.mrf.mxu0 }
 0xa14   : > { %v1820_v50 = vadd.f32 %v1819_v44, %v1807_v47 }
 0xa16   : > { %v1823_v51 = vadd.f32 %v1820_v50, %v1570_v17 }
 0xa18   : > { %v1826_v52 = vsel %vm1194_vm1, %v1823_v51, 0.0 }
 0xa19   : > { %v1808_v53 = vpop.f32.mrf.mxu2  ;;  %1827 = vadd.xlane.f32.xlu1 %v1826_v52 }
 0xa8c   : > { %v1828_v54 = vpop.xlane.xlu1 %1827 }
 0xa8d   : > { %v1829_v55 = vmul.f32 %v1828_v54, %v4102_v22 }
 0xa8f   : > { %v1830_v56 = vsub.f32 %v1823_v51, %v1829_v55 }
 0xa91   : > { %v1831_v57 = vmul.f32 %v1830_v56, %v1830_v56 }
 0xa93   : > { %v1832_v58 = vsel %vm1194_vm1, %v1831_v57, 0.0 }
 0xa94   : > { %1833 = vadd.xlane.f32.xlu2 %v1832_v58 }
 0xb07   : > { %v1834_v59 = vpop.xlane.xlu2 %1833 }
 0xb08   : > { %v1835_v60 = vmul.f32 %v1834_v59, %v4102_v22 }
 0xb0a   : > { %v1836_v61 = vadd.f32 1e-05, %v1835_v60 }
 0xb0c   : > { %3058 = vrsqrt.f32 %v1836_v61  ;;  %vm1843_vm13 = vweird.f32 %v1836_v61 }
 0xb12   : > { %v3059_v38 = vpop.eup %3058 }
 0xb13   : > { %v1838_v62 = vmul.f32 %v3059_v38, %v1836_v61  ;;  %vm1844_vm12 = vweird.f32 %v3059_v38 }
 0xb14   : > { %vm1845_vm14 = vmor %vm1843_vm13, %vm1844_vm12 }
 0xb15   : > { %v1839_v63 = vmul.f32 %v3059_v38, %v1838_v62 }
 0xb17   : > { %v1840_v0 = vmul.f32 0.5, %v1839_v63 }
 0xb19   : > { %v1841_v1 = vsub.f32 1.5, %v1840_v0 }
 0xb1b   : > { %v1842_v2 = vmul.f32 %v3059_v38, %v1841_v1 }
 0xb1d   : > { %v1846_v5 = vsel %vm1845_vm14, %v3059_v38, %v1842_v2 }
 0xb1e   : > { %v1847_v7 = vmul.f32 %v1846_v5, %v1830_v56 }
 0xb20   : > { %v1851_v8 = vmul.f32 %v3036_v4, %v1847_v7 }
 0xb22   : > { %v1855_v9 = vadd.f32 %v3037_v6, %v1851_v8  ;;  %1862 = sbr.rel (%p2688_p1) target bundleno = 3162 (0xc5a), region = 160 }
 0xb24   : > { %v1856_v22 = vpack.c.bf16 %v1855_v9, %v1855_v9 }
 0xb26   : > { %1858 = vst.msk [vmem:[#allocation2] sm:$0xf] %vm1857_vm15, %v1856_v22 }
 0xb27   : > { %v2836_v10 = vld [vmem:[#allocation16 + $0x18] sm:$0xff]  ;;  %v3566_v12 = vmov 0   ;;  %v2835_v13 = vld [vmem:[#allocation16 + $0x10] sm:$0xff]  ;;  %v2820_v17 = vld [vmem:[%s4402_s12 + $0x18] sm:$0xff]  ;;  %vm2114_vm0 = vcmask 522240   ;;  %vm2148_vm6 = vcmask 49152  }
 0xb28   : > { %v2832_v11 = vld [vmem:[#allocation15 + $0x18] sm:$0xff]  ;;  %3060 = vset.pattern.permute.xlu0 %v3566_v12  ;;  %2057 = vmatpush.bf16.msra.mxu2 %v2836_v10  ;;  %v2831_v14 = vld [vmem:[#allocation15 + $0x10] sm:$0xff]  ;;  %v2828_v19 = vld [vmem:[%s4403_s29 + $0x38] sm:$0xff] }
 0xb29   : > { %2094 = vmatpush.bf16.msra.mxu3 %v2832_v11  ;;  %v2118_v18 = vld [vmem:[#allocation3] sm:$0x1]  ;;  %v2834_v20 = vld [vmem:[#allocation16 + $0x8] sm:$0xff]  ;;  %1907 = vmatpush.bf16.msra.mxu0 %v2820_v17  ;;  %v2819_v23 = vld [vmem:[%s4402_s12 + $0x10] sm:$0xff] }
 0xb2a   : > { %v2830_v3 = vld [vmem:[#allocation15 + $0x8] sm:$0xff]  ;;  %2121 = vperm.xlu0 %3060, %v2118_v18   ;;  %1986 = vmatpush.bf16.msra.mxu1 %v2828_v19  ;;  %v2827_v25 = vld [vmem:[%s4404_s19 + $0x30] sm:$0xff]  ;;  %v2818_v28 = vld [vmem:[%s4402_s12 + $0x8] sm:$0xff] }
 0xb2b   : > { %v2833_v29 = vld [vmem:[#allocation16] sm:$0xff]  ;;  %v2826_v31 = vld [vmem:[%s4404_s19 + $0x28] sm:$0xff]  ;;  %v2817_v33 = vld [vmem:[%s4402_s12] sm:$0xff] }
 0xb2c   : > { %2058 = vmatpush.bf16.msra.mxu2 %v2835_v13  ;;  %v2829_v30 = vld [vmem:[#allocation15] sm:$0xff]  ;;  %v2825_v34 = vld [vmem:[%s4404_s19 + $0x20] sm:$0xff]  ;;  %v2822_v37 = vld [vmem:[%s4404_s19 + $0x8] sm:$0xff] }
 0xb2d   : > { %v1863_v15 = vld [vmem:[#allocation2] sm:$0xf]  ;;  %2095 = vmatpush.bf16.msra.mxu3 %v2831_v14  ;;  %1908 = vmatpush.bf16.msra.mxu0 %v2819_v23  ;;  %v2824_v35 = vld [vmem:[%s4404_s19 + $0x18] sm:$0xff]  ;;  %v2823_v36 = vld [vmem:[%s4404_s19 + $0x10] sm:$0xff] }
 0xb2e   : > { %v2017_v16 = vunpack.c.l.b16 %v1863_v15  ;;  %1987 = vmatpush.bf16.msra.mxu1 %v2827_v25  ;;  %v2821_v39 = vld [vmem:[%s4404_s19] sm:$0xff]  ;;  %v3063_v40 = vld [vmem:[#allocation12] ss:$0 sm:$0xff]  ;;  %v3061_v42 = vld [vmem:[#allocation18] ss:$0 sm:$0xff] }
 0xb2f   : > { %v3062_v50 = vld [vmem:[#allocation19] ss:$0 sm:$0xff]  ;;  %v3064_v38 = vld [vmem:[#allocation13] ss:$0 sm:$0xff] }
 0xb30   : > { %v2018_v21 = vpack.c.b16 %v2017_v16, %v2017_v16  ;;  %2059 = vmatpush.bf16.msra.mxu2 %v2834_v20 }
 0xb31   : > { %2096 = vmatpush.bf16.msra.mxu3 %v2830_v3  ;;  %1909 = vmatpush.bf16.msra.mxu0 %v2818_v28 }
 0xb32   : > { %v2022_v24 = vshll.u32 %v2018_v21, 16  ;;  %v2020_v26 = vshrl.u32 %v2018_v21, 16  ;;  %1988 = vmatpush.bf16.msra.mxu1 %v2826_v31 }
 0xb34   : > { %v2024_v27 = vrot.slane %v2022_v24, 1  ;;  %2060 = vmatpush.bf16.msra.mxu2 %v2833_v29 }
 0xb35   : > { %2097 = vmatpush.bf16.msra.mxu3 %v2829_v30  ;;  %1910 = vmatpush.bf16.msra.mxu0 %v2817_v33 }
 0xb36   : > { %v2025_v32 = vor.u32 %v2024_v27, %v2020_v26  ;;  %1989 = vmatpush.bf16.msra.mxu1 %v2825_v34 }
 0xb38   : > { %2754 = vmatmul.msk.bf16.vlgmr.msra.gmra.mxu2 %vm1194_vm1, %v2025_v32  ;;  %2771 = vmatmul.msk.bf16.vlgmr.msra.gmra.mxu3 %vm1194_vm1, %v1863_v15 }
 0xb39   : > { %2705 = vmatmul.msk.bf16.vlgmr.msra.gmra.mxu0 %vm1194_vm1, %v1863_v15 }
 0xb3a   : > { %1990 = vmatpush.bf16.msra.mxu1 %v2824_v35 }
 0xb3e   : > { %1991 = vmatpush.bf16.msra.mxu1 %v2823_v36 }
 0xb42   : > { %1992 = vmatpush.bf16.msra.mxu1 %v2822_v37 }
 0xb46   : > { %1993 = vmatpush.bf16.msra.mxu1 %v2821_v39 }
 0xb9c   : > { %v2122_v58 = vpop.permute.xlu0 %2121 }
 0xb9d   : > { %v2124_v59 = vperm.slane %v2122_v58, 0 }
 0xbb6   : > { %v1912_v41 = vpop.f32.mrf.mxu0 }
 0xbb7   : > { %v1913_v43 = vadd.f32 %v3063_v40, %v1912_v41 }
 0xbb9   : > { %v1916_v47 = vmax.f32 %v1913_v43, 0.0 }
 0xbbb   : > { %v2062_v44 = vpop.f32.mrf.mxu2  ;;  %v2099_v45 = vpop.f32.mrf.mxu3  ;;  %v1917_v51 = vpack.c.bf16 %v1916_v47, %v1916_v47 }
 0xbbc   : > { %v2100_v46 = vadd.f32 %v2099_v45, %v2062_v44 }
 0xbbd   : > { %1994 = vmatmul.bf16.vlgmr.msra.gmra.mxu1 %v1917_v51 }
 0xbbe   : > { %v2107_v49 = vadd.f32 %v3061_v42, %v2100_v46  ;;  %v1914_v53 = vpop.f32.mrf.mxu0 }
 0xbc0   : > { %v2108_v52 = vmax.f32 %v2107_v49, 0.0 }
 0xbc2   : > { %v2113_v54 = vmul.f32 %v3062_v50, %v2108_v52 }
 0xbc3   : > { %v2064_v55 = vpop.f32.mrf.mxu2  ;;  %v2101_v56 = vpop.f32.mrf.mxu3 }
 0xbc4   : > { %v2115_v57 = vsel %vm2114_vm0, %v2113_v54, 0.0 }
 0xbc5   : > { %2116 = vadd.xlane.f32.xlu0 %v2115_v57 }
 0xc38   : > { %v2117_v60 = vpop.xlane.xlu0 %2116 }
 0xc39   : > { %v2125_v61 = vadd.f32 %v2124_v59, %v2117_v60 }
 0xc3a   : > { %v1995_v63 = vpop.f32.mrf.mxu1 }
 0xc3b   : > { %v2772_v62 = vmul.f32 -1.442695, %v2125_v61  ;;  %v1996_v0 = vadd.f32 %v3064_v38, %v1995_v63 }
 0xc3d   : > { %3065 = vpow2.f32 %v2772_v62  ;;  %1999 = vst.msk [vmem:[%s3994_s8] sm:$0xff] %vm1194_vm1, %v1996_v0 }
 0xc42   : > { %v1997_v4 = vpop.f32.mrf.mxu1 }
 0xc43   : > { %v3066_v1 = vpop.eup %3065 }
 0xc44   : > { %v2129_v2 = vadd.f32 1.0, %v3066_v1 }
 0xc46   : > { %3067 = vrcp.f32 %v2129_v2  ;;  %v2141_v8 = vand.u32 2147483648, %v2129_v2  ;;  %v2139_v22 = vand.u32 2147483647, %v2129_v2  ;;  %vm2135_vm3 = vweird.f32 %v2129_v2 }
 0xc48   : > { %v2142_v11 = vor.u32 1.1754944e-38, %v2141_v8  ;;  %vm2140_vm5 = vcmp.eq.f32.partialorder %v2139_v22, 8.507059e+37 }
 0xc4c   : > { %v3068_v5 = vpop.eup %3067 }
 0xc4d   : > { %v2131_v6 = vmul.f32 %v3068_v5, %v2129_v2  ;;  %vm2136_vm2 = vweird.f32 %v3068_v5 }
 0xc4e   : > { %vm2137_vm4 = vmor %vm2135_vm3, %vm2136_vm2 }
 0xc4f   : > { %v2132_v7 = vsub.f32 1.0, %v2131_v6 }
 0xc51   : > { %v2133_v9 = vmul.f32 %v3068_v5, %v2132_v7 }
 0xc53   : > { %v2134_v10 = vadd.f32 %v3068_v5, %v2133_v9 }
 0xc55   : > { %v2138_v12 = vsel %vm2137_vm4, %v3068_v5, %v2134_v10 }
 0xc56   : > { %v2143_v13 = vsel %vm2140_vm5, %v2142_v11, %v2138_v12 }
 0xc57   : > { %v2146_v14 = vperm.slane %v2143_v13, %v4037_v48 }
 0xc59   : > { %2149 = vst.msk [vmem:[%s1088_s30] sm:$0x1] %vm2148_vm6, %v2146_v14 }
 0xc5a PF: > { %s4405_s23 = sld [smem:[#allocation38_spill]]  ;;  %s2167_s28 = sshll.u32 %s3994_s8, 4  ;;  %s2168_s28 = int_to_ptr.vmem [resolvable:$true] %s2167_s28 }
 0xc5b   : > { %s4407_s29 = sld [smem:[#allocation70_spill]]  ;;  %s2151_s2 = scalar_lea.sflag [#allocation6], %s3940_s14 }
 0xc60   : > { %s2774_s10 = sshll.u32 %s4405_s23, 3 }
 0xc61   : > { %s4408_s26 = smov %s4407_s29  ;;  %s2165_s0 = scalar_lea.hbm %s4407_s29, %s2774_s10 }
 0xc62   : > { %s2169_s6 = sshll.u32 %s2165_s0, 4  ;;  %s3389_s9 = scalar_lea.hbm %s4408_s26, 16  ;;  %s2170_s6 = int_to_ptr.hbm [resolvable:$true] %s2169_s6 }
 0xc63   : > { %s3383_s25 = sshra.s32 %s2170_s6, 4  ;;  %s3384_s25 = int_to_ptr.hbm [resolvable:$true] %s3383_s25 }
 0xc64   : > { %s3385_s27 = scalar_lea.hbm %s3384_s25, 8  ;;  %p3390_p5 = scmp.lt.s32.totalorder %s3384_s25, %s4408_s26 }
 0xc65   : > { %p3386_p2 = scmp.ne.s32.totalorder %s3384_s25, %s3385_s27  ;;  %p3391_p7 = scmp.lt.s32.totalorder %s3389_s9, %s3385_s27 }
 0xc67   : > { %p3387_p3 = pnand %p3386_p2, %p3761_p6  ;;  %p3392_p10 = por %p3391_p7, %p3390_p5 }
 0xc69   : > { %p3388_p4 = pneg %p3387_p3 }
 0xc6b   : > { %p3393_p12 = pnand %p3392_p10, %p3388_p4 }
 0xc6d   : > { %3396 = shalt.err (!%p3393_p12)
}
 0xc6e   : > { %2869 = dma.vmem_to_hbm [thread:$0]  (%p3761_p6), %s2168_s28, 128, %s2170_s6, %s2151_s2  }
 0xc6f   : > { %s4409_s4 = sld [smem:[#allocation71_spill]]  ;;  %s2180_s17 = sshll.u32 %s1088_s30, 4  ;;  %s2181_s17 = int_to_ptr.vmem [resolvable:$true] %s2180_s17 }
 0xc70   : > { %s2156_s24 = scalar_lea.sflag [#allocation23], %s3940_s14 }
 0xc75   : > { %s2178_s21 = scalar_lea.hbm %s4409_s4, %s4405_s23  ;;  %s3417_s16 = scalar_lea.hbm %s4409_s4, 2 }
 0xc76   : > { %s2182_s18 = sshll.u32 %s2178_s21, 4  ;;  %s2183_s18 = int_to_ptr.hbm [resolvable:$true] %s2182_s18 }
 0xc77   : > { %s3411_s7 = sshra.s32 %s2183_s18, 4  ;;  %s3412_s7 = int_to_ptr.hbm [resolvable:$true] %s3411_s7 }
 0xc78   : > { %s3413_s1 = scalar_lea.hbm %s3412_s7, 1  ;;  %p3418_p0 = scmp.lt.s32.totalorder %s3412_s7, %s4409_s4 }
 0xc79   : > { %p3414_p13 = scmp.ne.s32.totalorder %s3412_s7, %s3413_s1  ;;  %p3419_p1 = scmp.lt.s32.totalorder %s3417_s16, %s3413_s1 }
 0xc7b   : > { %p3415_p9 = pnand %p3414_p13, %p3761_p6  ;;  %p3420_p2 = por %p3419_p1, %p3418_p0 }
 0xc7d   : > { %p3416_p11 = pneg %p3415_p9 }
 0xc7f   : > { %p3421_p3 = pnand %p3420_p2, %p3416_p11 }
 0xc81   : > { %3424 = shalt.err (!%p3421_p3)
}
 0xc82   : > { %2870 = dma.vmem_to_hbm [thread:$0]  (%p3761_p6), %s2181_s17, 16, %s2183_s18, %s2156_s24  }
 0xc83 PF: > { %s4410_s14 = sld [smem:[#allocation41_spill]] }
 0xc84   : > { %s4411_s30 = sld [smem:[#allocation33_spill]] }
 0xc89   : > { %p2925_p4 = scmp.ge.s32.totalorder %s4410_s14, 2 }
 0xc8a   : > { %s2194_s28 = sand.u32 1, %s4411_s30  }
 0xc8b   : > { %p2906_p5 = pnand %p2925_p4, %p3766_p8  ;;  %s2195_s6 = scalar_lea.sflag [#allocation6], %s2194_s28 }
 0xc8d   : > { %p2907_p7 = pneg %p2906_p5 }
 0xc8f   : > { %3498 = dma.done.wait (%p2907_p7), %s2195_s6, 128  }
 0xc90   : > { %3500 = vsyncadd (%p2907_p7), %s2195_s6, 4294967168  ;;  %s2205_s2 = scalar_lea.sflag [#allocation23], %s2194_s28 }
 0xc91   : > { %3502 = dma.done.wait (%p2907_p7), %s2205_s2, 16  }
 0xc92   : > { %3504 = vsyncadd (%p2907_p7), %s2205_s2, 4294967280  ;;  %s55_s25 = sadd.s32 1, %s4410_s14   ;;  %s4413_s27 = sld [smem:[#allocation34_spill]] }
 0xc93   : > { %p52_p10 = scmp.ge.s32.totalorder %s55_s25, 6   ;;  %s4414_s28 = sld [smem:[#allocation35_spill]] }
 0xc94   : > { %s4415_s6 = sld [smem:[#allocation47_spill]] }
 0xc95   : > { %s4416_s22 = sld [smem:[#allocation36_spill]] }
 0xc96   : > { %s4417_s2 = sld [smem:[#allocation37_spill]] }
 0xc97   : > { %s4418_s29 = sld [smem:[#allocation46_spill]]  ;;  %54 = sbr.rel (!%p52_p10) target bundleno = 43 (0x2b), region = 270 }
 0xc98   : > { %s4419_s0 = sld [smem:[#allocation39_spill]] }
 0xc99   : > { %s4420_s7 = sld [smem:[#allocation40_spill]] }
 0xc9a   : > { %s4421_s30 = sld [smem:[#allocation44_spill]] }
 0xc9b   : > { %s4422_s3 = sld [smem:[#allocation45_spill]] }
 0xc9c   :  { %2210 = vsyncpa [#allocation5], 1 }
 0xc9d   :  { %2212 = vsyncpa [#allocation5 + $0x1], 1 }
 0xc9e   :  { %2213 = vsyncpa [#allocation8], 1 }
 0xc9f   :  { %2215 = vsyncpa [#allocation8 + $0x1], 1 }
 0xca0   :  { %2216 = vsyncpa [#allocation11], 1 }
 0xca1   :  { %2218 = vsyncpa [#allocation11 + $0x1], 1 }
 0xca2   :  { %2219 = vsyncpa [#allocation14], 1 }
 0xca3   :  { %2220 = vsyncpa [#allocation17], 1 }
 0xca4   :  { %2221 = vsyncpa [#allocation20], 1 }
 0xca5   :  { %2222 = vsyncpa [#allocation6], 1 }
 0xca6   :  { %2224 = vsyncpa [#allocation6 + $0x1], 1 }
 0xca7   :  { %2225 = vsyncpa [#allocation23], 1 }
 0xca8   :  { %2227 = vsyncpa [#allocation23 + $0x1], 1 }

</bundles_post_ra>
